<compile_context>
chip_gen: v6e
topology: v6e:2x2x1
jax: 0.10.0
libtpu: 0.0.40
codegen_flags: <defaults>
</compile_context>

<pallas_src>
import math

import jax
import jax.numpy as jnp
from jax import lax
from jax.experimental import pallas as pl
from jax.experimental.pallas import tpu as pltpu

# Small synthetic BERT-like config.
VOCAB = 100
B, S = 2, 8          # batch, sequence length
H = 32               # hidden size (stand-in for 768)
NH, DH = 4, 8        # heads, head dim (NH * DH == H)
FF = 64              # FFN intermediate size
L = 2                # number of encoder layers
OUT = 12             # output_size
OUT_PAD = 128        # lane-dense padded output width (sliced back to OUT in glue)
LN_EPS = 1e-12       # BERT LayerNorm eps


def _layernorm(x, g, b):
    mu = jnp.mean(x, axis=-1, keepdims=True)
    xc = x - mu
    var = jnp.mean(xc * xc, axis=-1, keepdims=True)
    inv = lax.rsqrt(var + LN_EPS)
    return xc * inv * g + b


def _gelu(x):
    # tanh-approximate GELU (EUP-friendly); f32 math.
    # TODO(synk): bert-base uses erf GELU; tanh approx differs slightly.
    c = math.sqrt(2.0 / math.pi)
    return 0.5 * x * (1.0 + jnp.tanh(c * (x + 0.044715 * x * x * x)))


def _bf16(x):
    return x.astype(jnp.bfloat16)


def encoder_decoder_kernel(
    x_ref, emb_g_ref, emb_b_ref,
    wqkv_ref, bqkv_ref, wo_ref, bo_ref,
    ln1g_ref, ln1b_ref,
    w1_ref, b1_ref, w2_ref, b2_ref,
    ln2g_ref, ln2b_ref,
    decw_ref, decb_ref,
    out_ref,          # output: [B, OUT_PAD] float32 (lane-dense store)
    x2_ref,           # VMEM scratch: [B*S, H] f32, carried across the layer grid
):
    l = pl.program_id(0)

    # --- Embeddings LayerNorm, only on the first grid step. ---
    @pl.when(l == 0)
    def _():
        x0 = x_ref[...].reshape(B * S, H)
        x2_ref[...] = _layernorm(x0, emb_g_ref[...], emb_b_ref[...])

    x2 = x2_ref[...]                                   # [B*S, H] f32

    # --- Fused QKV projection: one [B*S,H] x [H,3H] bf16 MXU dot. ---
    qkv = jnp.dot(_bf16(x2), wqkv_ref[0],
                  preferred_element_type=jnp.float32) + bqkv_ref[0]
    qkv3 = _bf16(qkv).reshape(B, S, 3 * H)             # leading-dim split (cheap)

    # --- Head-batched q/k/v: [B*NH, S, DH], batch index = h*B + b. ---
    # Per-head 8-lane slices + leading-dim concatenation; no sublane relayout of S.
    qs = jnp.concatenate(
        [qkv3[:, :, 0 * H + h * DH: 0 * H + (h + 1) * DH] for h in range(NH)], axis=0)
    ks = jnp.concatenate(
        [qkv3[:, :, 1 * H + h * DH: 1 * H + (h + 1) * DH] for h in range(NH)], axis=0)
    vs = jnp.concatenate(
        [qkv3[:, :, 2 * H + h * DH: 2 * H + (h + 1) * DH] for h in range(NH)], axis=0)

    # --- One batched contraction for all B*NH score tiles. ---
    s = jnp.einsum("bqd,bkd->bqk", qs, ks,
                   preferred_element_type=jnp.float32)           # [B*NH, S, S]
    # Batched softmax (no attention mask: fixed-length, unpadded inputs).
    # Note: at S=8 the reduce axis uses only 8 of 128 lanes; lane-sparse layout
    # resolves itself at real S >= 128.
    p = jnp.exp(s - jnp.max(s, axis=-1, keepdims=True))
    # approx=True -> EUP vrcp; rows sum to ~1 (documented small deviation).
    p = p * pl.reciprocal(jnp.sum(p, axis=-1, keepdims=True), approx=True)

    # --- One batched contraction for all contexts, then head re-assembly. ---
    ctx = jnp.einsum("bqk,bkd->bqd", _bf16(p), vs,
                     preferred_element_type=jnp.float32)         # [B*NH, S, DH]
    ctx = jnp.concatenate([ctx[h * B:(h + 1) * B] for h in range(NH)],
                          axis=-1)                               # [B, S, H]

    attn = jnp.dot(_bf16(ctx.reshape(B * S, H)), wo_ref[0],
                   preferred_element_type=jnp.float32) + bo_ref[0]
    x2 = _layernorm(x2 + attn, ln1g_ref[0], ln1b_ref[0])

    # --- FFN. ---
    ff = jnp.dot(_bf16(x2), w1_ref[0],
                 preferred_element_type=jnp.float32) + b1_ref[0]
    ff = _gelu(ff)
    ff = jnp.dot(_bf16(ff), w2_ref[0],
                 preferred_element_type=jnp.float32) + b2_ref[0]
    x2 = _layernorm(x2 + ff, ln2g_ref[0], ln2b_ref[0])

    x2_ref[...] = x2                                   # carry to next layer

    # --- Decoder on the CLS token, only on the last grid step. ---
    @pl.when(l == L - 1)
    def _():
        cls = x2.reshape(B, S, H)[:, 0, :]                       # [B, H]
        out_ref[...] = (jnp.dot(_bf16(cls), decw_ref[...],
                                preferred_element_type=jnp.float32)
                        + decb_ref[...])               # full [B, 128] unmasked store


def init_params(key):
    def nrm(k, shape):
        return (0.02 * jax.random.normal(k, shape)).astype(jnp.float32)

    ks = iter(jax.random.split(key, 16))
    scale = 1.0 / math.sqrt(DH)

    wq = nrm(next(ks), (L, H, H))
    wk = nrm(next(ks), (L, H, H))
    wv = nrm(next(ks), (L, H, H))
    bq = jnp.zeros((L, H), jnp.float32)
    bk = jnp.zeros((L, H), jnp.float32)
    bv = jnp.zeros((L, H), jnp.float32)
    # Fold the 1/sqrt(DH) attention scale into BOTH the Q weight and Q bias.
    wqkv = jnp.concatenate([wq * scale, wk, wv], axis=-1)              # [L, H, 3H]
    bqkv = jnp.concatenate([bq * scale, bk, bv], axis=-1)[:, None, :]  # [L, 1, 3H]

    # torch nn.Linear(H, OUT) weight is [OUT, H]; pre-transpose to [H, OUT] and
    # zero-pad the output dim to 128 lanes so the kernel's final store is
    # lane-dense (unmasked vst); wrapper slices back to OUT.
    dec_w = nrm(next(ks), (OUT, H))
    dec_w_pad = jnp.zeros((H, OUT_PAD), jnp.float32).at[:, :OUT].set(dec_w.T)

    p = {
        "word_emb": nrm(next(ks), (VOCAB, H)),
        "pos_emb": nrm(next(ks), (S, H)),
        "type_emb": nrm(next(ks), (2, H)),
        "emb_g": jnp.ones((1, H), jnp.float32),
        "emb_b": jnp.zeros((1, H), jnp.float32),
        # Matmul weights stored bf16 (MXU-native); biases / LN params f32.
        "wqkv": wqkv.astype(jnp.bfloat16),
        "bqkv": bqkv,
        "wo": nrm(next(ks), (L, H, H)).astype(jnp.bfloat16),
        "bo": jnp.zeros((L, 1, H), jnp.float32),
        "ln1g": jnp.ones((L, 1, H), jnp.float32),
        "ln1b": jnp.zeros((L, 1, H), jnp.float32),
        "w1": nrm(next(ks), (L, H, FF)).astype(jnp.bfloat16),
        "b1": jnp.zeros((L, 1, FF), jnp.float32),
        "w2": nrm(next(ks), (L, FF, H)).astype(jnp.bfloat16),
        "b2": jnp.zeros((L, 1, H), jnp.float32),
        "ln2g": jnp.ones((L, 1, H), jnp.float32),
        "ln2b": jnp.zeros((L, 1, H), jnp.float32),
        "dec_w": dec_w_pad.astype(jnp.bfloat16),
        "dec_b": jnp.zeros((1, OUT_PAD), jnp.float32),
    }
    return p


def _layer_spec(*tail):
    """BlockSpec for a [L, *tail] per-layer weight: block (1, *tail), indexed by l."""
    nt = len(tail)
    return pl.BlockSpec((1, *tail), lambda l, _nt=nt: (l,) + (0,) * _nt)


def _const_spec(*dims):
    """BlockSpec for an array that is constant across the layer grid axis."""
    nd = len(dims)
    return pl.BlockSpec(dims, lambda l, _nd=nd: (0,) * _nd)


def text_summarization_forward(token_ids, params):
    # Embedding gather + position/type embedding sum (glue; gather stays in JAX).
    x = (params["word_emb"][token_ids]
         + params["pos_emb"][None, :, :]
         + params["type_emb"][0][None, None, :]).astype(jnp.float32)   # [B, S, H]

    ins = [
        x, params["emb_g"], params["emb_b"],
        params["wqkv"], params["bqkv"], params["wo"], params["bo"],
        params["ln1g"], params["ln1b"],
        params["w1"], params["b1"], params["w2"], params["b2"],
        params["ln2g"], params["ln2b"],
        params["dec_w"], params["dec_b"],
    ]

    in_specs = [
        _const_spec(B, S, H),                              # x (used only at l == 0)
        _const_spec(1, H), _const_spec(1, H),              # embedding LN gamma/beta
        _layer_spec(H, 3 * H), _layer_spec(1, 3 * H),      # wqkv, bqkv
        _layer_spec(H, H), _layer_spec(1, H),              # wo, bo
        _layer_spec(1, H), _layer_spec(1, H),              # ln1 gamma/beta
        _layer_spec(H, FF), _layer_spec(1, FF),            # w1, b1
        _layer_spec(FF, H), _layer_spec(1, H),             # w2, b2
        _layer_spec(1, H), _layer_spec(1, H),              # ln2 gamma/beta
        _const_spec(H, OUT_PAD), _const_spec(1, OUT_PAD),  # decoder (used at l == L-1)
    ]

    # Grid axis over encoder layers ("arbitrary": x2 scratch is carried across l);
    # per-layer weight blocks are automatically double-buffered/prefetched.
    # TODO(synk): at real scale add a leading "parallel" batch axis (2 TCs on v7x)
    # and set vmem_limit_bytes sized for v7x's 64 MiB VMEM.
    out_pad = pl.pallas_call(
        encoder_decoder_kernel,
        out_shape=jax.ShapeDtypeStruct((B, OUT_PAD), jnp.float32),
        grid=(L,),
        in_specs=in_specs,
        out_specs=_const_spec(B, OUT_PAD),
        scratch_shapes=[pltpu.VMEM((B * S, H), jnp.float32)],
        compiler_params=pltpu.CompilerParams(
            dimension_semantics=("arbitrary",)),
    )(*ins)

    return out_pad[:, :OUT]                                # [B, OUT] f32


if __name__ == "__main__":
    key = jax.random.PRNGKey(0)
    k_ids, k_par = jax.random.split(key)
    token_ids = jax.random.randint(k_ids, (B, S), 0, VOCAB, dtype=jnp.int32)
    params = init_params(k_par)

    out = text_summarization_forward(token_ids, params)
    jax.block_until_ready(out)
    assert out.shape == (B, OUT) and out.dtype == jnp.float32
    print("KERNEL_OK")
</pallas_src>

<mosaic_0001>
module attributes {stable_mosaic.version = 11 : i64} {
  func.func @encoder_decoder_kernel(%arg0: i32, %arg1: memref<2x8x32xf32, #tpu.memory_space<vmem>>, %arg2: memref<1x32xf32, #tpu.memory_space<vmem>>, %arg3: memref<1x32xf32, #tpu.memory_space<vmem>>, %arg4: memref<1x32x96xbf16, #tpu.memory_space<vmem>>, %arg5: memref<1x1x96xf32, #tpu.memory_space<vmem>>, %arg6: memref<1x32x32xbf16, #tpu.memory_space<vmem>>, %arg7: memref<1x1x32xf32, #tpu.memory_space<vmem>>, %arg8: memref<1x1x32xf32, #tpu.memory_space<vmem>>, %arg9: memref<1x1x32xf32, #tpu.memory_space<vmem>>, %arg10: memref<1x32x64xbf16, #tpu.memory_space<vmem>>, %arg11: memref<1x1x64xf32, #tpu.memory_space<vmem>>, %arg12: memref<1x64x32xbf16, #tpu.memory_space<vmem>>, %arg13: memref<1x1x32xf32, #tpu.memory_space<vmem>>, %arg14: memref<1x1x32xf32, #tpu.memory_space<vmem>>, %arg15: memref<1x1x32xf32, #tpu.memory_space<vmem>>, %arg16: memref<32x128xbf16, #tpu.memory_space<vmem>>, %arg17: memref<1x128xf32, #tpu.memory_space<vmem>>, %arg18: memref<2x128xf32, #tpu.memory_space<vmem>>, %arg19: memref<16x32xf32, #tpu.memory_space<vmem>>) attributes {dimension_semantics = [#tpu.dimension_semantics<arbitrary>], iteration_bounds = array<i64: 2>, scalar_prefetch = 0 : i64, scratch_operands = 1 : i64, tpu.core_type = #tpu.core_type<tc>, window_params = [{pipeline_mode = #tpu.pipeline_mode<synchronous>, transform_indices = @transform_0, window_bounds = array<i64: 2, 8, 32>}, {pipeline_mode = #tpu.pipeline_mode<synchronous>, transform_indices = @transform_1, window_bounds = array<i64: 1, 32>}, {pipeline_mode = #tpu.pipeline_mode<synchronous>, transform_indices = @transform_2, window_bounds = array<i64: 1, 32>}, {transform_indices = @transform_3, window_bounds = array<i64: 1, 32, 96>}, {transform_indices = @transform_4, window_bounds = array<i64: 1, 1, 96>}, {transform_indices = @transform_5, window_bounds = array<i64: 1, 32, 32>}, {transform_indices = @transform_6, window_bounds = array<i64: 1, 1, 32>}, {transform_indices = @transform_7, window_bounds = array<i64: 1, 1, 32>}, {transform_indices = @transform_8, window_bounds = array<i64: 1, 1, 32>}, {transform_indices = @transform_9, window_bounds = array<i64: 1, 32, 64>}, {transform_indices = @transform_10, window_bounds = array<i64: 1, 1, 64>}, {transform_indices = @transform_11, window_bounds = array<i64: 1, 64, 32>}, {transform_indices = @transform_12, window_bounds = array<i64: 1, 1, 32>}, {transform_indices = @transform_13, window_bounds = array<i64: 1, 1, 32>}, {transform_indices = @transform_14, window_bounds = array<i64: 1, 1, 32>}, {pipeline_mode = #tpu.pipeline_mode<synchronous>, transform_indices = @transform_15, window_bounds = array<i64: 32, 128>}, {pipeline_mode = #tpu.pipeline_mode<synchronous>, transform_indices = @transform_16, window_bounds = array<i64: 1, 128>}, {pipeline_mode = #tpu.pipeline_mode<synchronous>, transform_indices = @transform_17, window_bounds = array<i64: 2, 128>}]} {
    %c0_i32 = arith.constant 0 : i32
    %0 = arith.cmpi eq, %arg0, %c0_i32 : i32
    %1 = arith.extui %0 : i1 to i32
    %c0_i32_0 = arith.constant 0 : i32
    %2 = arith.cmpi ne, %1, %c0_i32_0 : i32
    scf.if %2 {
      %c0_62 = arith.constant 0 : index
      %c0_63 = arith.constant 0 : index
      %c0_64 = arith.constant 0 : index
      %139 = vector.load %arg1[%c0_62, %c0_63, %c0_64] : memref<2x8x32xf32, #tpu.memory_space<vmem>>, vector<2x8x32xf32>
      %140 = vector.shape_cast %139 : vector<2x8x32xf32> to vector<16x32xf32>
      %c0_65 = arith.constant 0 : index
      %c0_66 = arith.constant 0 : index
      %141 = vector.load %arg2[%c0_65, %c0_66] : memref<1x32xf32, #tpu.memory_space<vmem>>, vector<1x32xf32>
      %c0_67 = arith.constant 0 : index
      %c0_68 = arith.constant 0 : index
      %142 = vector.load %arg3[%c0_67, %c0_68] : memref<1x32xf32, #tpu.memory_space<vmem>>, vector<1x32xf32>
      %cst_69 = arith.constant dense<0.000000e+00> : vector<16xf32>
      %143 = vector.multi_reduction <add>, %140, %cst_69 [1] : vector<16x32xf32> to vector<16xf32>
      %144 = vector.shape_cast %143 : vector<16xf32> to vector<16x1xf32>
      %cst_70 = arith.constant 3.200000e+01 : f32
      %145 = vector.broadcast %cst_70 : f32 to vector<16x1xf32>
      %146 = arith.divf %144, %145 : vector<16x1xf32>
      %147 = vector.broadcast %146 : vector<16x1xf32> to vector<16x32xf32>
      %148 = arith.subf %140, %147 : vector<16x32xf32>
      %149 = arith.mulf %148, %148 : vector<16x32xf32>
      %cst_71 = arith.constant dense<0.000000e+00> : vector<16xf32>
      %150 = vector.multi_reduction <add>, %149, %cst_71 [1] : vector<16x32xf32> to vector<16xf32>
      %151 = vector.shape_cast %150 : vector<16xf32> to vector<16x1xf32>
      %cst_72 = arith.constant 3.200000e+01 : f32
      %152 = vector.broadcast %cst_72 : f32 to vector<16x1xf32>
      %153 = arith.divf %151, %152 : vector<16x1xf32>
      %cst_73 = arith.constant 9.99999996E-13 : f32
      %154 = vector.broadcast %cst_73 : f32 to vector<16x1xf32>
      %155 = arith.addf %153, %154 : vector<16x1xf32>
      %156 = math.rsqrt %155 : vector<16x1xf32>
      %157 = vector.broadcast %156 : vector<16x1xf32> to vector<16x32xf32>
      %158 = arith.mulf %148, %157 : vector<16x32xf32>
      %159 = vector.broadcast %141 : vector<1x32xf32> to vector<16x32xf32>
      %160 = arith.mulf %158, %159 : vector<16x32xf32>
      %161 = vector.broadcast %142 : vector<1x32xf32> to vector<16x32xf32>
      %162 = arith.addf %160, %161 : vector<16x32xf32>
      %c0_74 = arith.constant 0 : index
      %c0_75 = arith.constant 0 : index
      %163 = vector.load %arg19[%c0_74, %c0_75] : memref<16x32xf32, #tpu.memory_space<vmem>>, vector<16x32xf32>
      tpu.vector_store %arg19[%c0_74, %c0_75], %162 {strides = array<i32>} : memref<16x32xf32, #tpu.memory_space<vmem>>, vector<16x32xf32>,
    } else {
    }
    %c0 = arith.constant 0 : index
    %c0_1 = arith.constant 0 : index
    %3 = vector.load %arg19[%c0, %c0_1] : memref<16x32xf32, #tpu.memory_space<vmem>>, vector<16x32xf32>
    %4 = arith.truncf %3 : vector<16x32xf32> to vector<16x32xbf16>
    %c0_2 = arith.constant 0 : index
    %c0_3 = arith.constant 0 : index
    %c0_4 = arith.constant 0 : index
    %5 = vector.load %arg4[%c0_2, %c0_3, %c0_4] : memref<1x32x96xbf16, #tpu.memory_space<vmem>>, vector<1x32x96xbf16>
    %6 = vector.shape_cast %5 : vector<1x32x96xbf16> to vector<32x96xbf16>
    %cst = arith.constant dense<0.000000e+00> : vector<16x96xf32>
    %7 = tpu.matmul %4, %6, %cst {dimension_numbers = #tpu.dot_dimension_numbers<[1], [0], [0], [1], [0, 0, 1, 1], [], []>} : vector<16x32xbf16>, vector<32x96xbf16>, vector<16x96xf32> -> vector<16x96xf32>
    %c0_5 = arith.constant 0 : index
    %c0_6 = arith.constant 0 : index
    %c0_7 = arith.constant 0 : index
    %8 = vector.load %arg5[%c0_5, %c0_6, %c0_7] : memref<1x1x96xf32, #tpu.memory_space<vmem>>, vector<1x1x96xf32>
    %9 = vector.shape_cast %8 : vector<1x1x96xf32> to vector<1x96xf32>
    %10 = vector.broadcast %9 : vector<1x96xf32> to vector<16x96xf32>
    %11 = arith.addf %7, %10 : vector<16x96xf32>
    %12 = arith.truncf %11 : vector<16x96xf32> to vector<16x96xbf16>
    %13 = vector.shape_cast %12 : vector<16x96xbf16> to vector<2x8x96xbf16>
    %14 = vector.extract_strided_slice %13 {offsets = [0, 0, 0], sizes = [2, 8, 8], strides = [1, 1, 1]} : vector<2x8x96xbf16> to vector<2x8x8xbf16>
    %15 = vector.extract_strided_slice %13 {offsets = [0, 0, 8], sizes = [2, 8, 8], strides = [1, 1, 1]} : vector<2x8x96xbf16> to vector<2x8x8xbf16>
    %16 = vector.extract_strided_slice %13 {offsets = [0, 0, 16], sizes = [2, 8, 8], strides = [1, 1, 1]} : vector<2x8x96xbf16> to vector<2x8x8xbf16>
    %17 = vector.extract_strided_slice %13 {offsets = [0, 0, 24], sizes = [2, 8, 8], strides = [1, 1, 1]} : vector<2x8x96xbf16> to vector<2x8x8xbf16>
    %18 = tpu.concatenate %14, %15, %16, %17 in 0 : vector<2x8x8xbf16>, vector<2x8x8xbf16>, vector<2x8x8xbf16>, vector<2x8x8xbf16> -> vector<8x8x8xbf16>
    %19 = vector.extract_strided_slice %13 {offsets = [0, 0, 32], sizes = [2, 8, 8], strides = [1, 1, 1]} : vector<2x8x96xbf16> to vector<2x8x8xbf16>
    %20 = vector.extract_strided_slice %13 {offsets = [0, 0, 40], sizes = [2, 8, 8], strides = [1, 1, 1]} : vector<2x8x96xbf16> to vector<2x8x8xbf16>
    %21 = vector.extract_strided_slice %13 {offsets = [0, 0, 48], sizes = [2, 8, 8], strides = [1, 1, 1]} : vector<2x8x96xbf16> to vector<2x8x8xbf16>
    %22 = vector.extract_strided_slice %13 {offsets = [0, 0, 56], sizes = [2, 8, 8], strides = [1, 1, 1]} : vector<2x8x96xbf16> to vector<2x8x8xbf16>
    %23 = tpu.concatenate %19, %20, %21, %22 in 0 : vector<2x8x8xbf16>, vector<2x8x8xbf16>, vector<2x8x8xbf16>, vector<2x8x8xbf16> -> vector<8x8x8xbf16>
    %24 = vector.extract_strided_slice %13 {offsets = [0, 0, 64], sizes = [2, 8, 8], strides = [1, 1, 1]} : vector<2x8x96xbf16> to vector<2x8x8xbf16>
    %25 = vector.extract_strided_slice %13 {offsets = [0, 0, 72], sizes = [2, 8, 8], strides = [1, 1, 1]} : vector<2x8x96xbf16> to vector<2x8x8xbf16>
    %26 = vector.extract_strided_slice %13 {offsets = [0, 0, 80], sizes = [2, 8, 8], strides = [1, 1, 1]} : vector<2x8x96xbf16> to vector<2x8x8xbf16>
    %27 = vector.extract_strided_slice %13 {offsets = [0, 0, 88], sizes = [2, 8, 8], strides = [1, 1, 1]} : vector<2x8x96xbf16> to vector<2x8x8xbf16>
    %28 = tpu.concatenate %24, %25, %26, %27 in 0 : vector<2x8x8xbf16>, vector<2x8x8xbf16>, vector<2x8x8xbf16>, vector<2x8x8xbf16> -> vector<8x8x8xbf16>
    "tpu.trace_start"() <{level = 10 : i32, message = "bqd,bkd->bqk"}> : () -> ()
    %cst_8 = arith.constant dense<0.000000e+00> : vector<8x8x8xf32>
    %29 = tpu.matmul %18, %23, %cst_8 {dimension_numbers = #tpu.dot_dimension_numbers<[2], [2], [1], [1], [0, 0, 0, 1, 1, 1], [0], [0]>} : vector<8x8x8xbf16>, vector<8x8x8xbf16>, vector<8x8x8xf32> -> vector<8x8x8xf32>
    "tpu.trace_stop"() : () -> ()
    %cst_9 = arith.constant dense<0xFF800000> : vector<8x8xf32>
    %30 = vector.multi_reduction <maximumf>, %29, %cst_9 [2] : vector<8x8x8xf32> to vector<8x8xf32>
    %31 = vector.shape_cast %30 : vector<8x8xf32> to vector<8x8x1xf32>
    %32 = vector.broadcast %31 : vector<8x8x1xf32> to vector<8x8x8xf32>
    %33 = arith.subf %29, %32 : vector<8x8x8xf32>
    %34 = math.exp %33 : vector<8x8x8xf32>
    %cst_10 = arith.constant dense<0.000000e+00> : vector<8x8xf32>
    %35 = vector.multi_reduction <add>, %34, %cst_10 [2] : vector<8x8x8xf32> to vector<8x8xf32>
    %36 = vector.shape_cast %35 : vector<8x8xf32> to vector<8x8x1xf32>
    %37 = tpu.reciprocal %36 {approx = true} : vector<8x8x1xf32> -> vector<8x8x1xf32>
    %38 = vector.broadcast %37 : vector<8x8x1xf32> to vector<8x8x8xf32>
    %39 = arith.mulf %34, %38 : vector<8x8x8xf32>
    %40 = arith.truncf %39 : vector<8x8x8xf32> to vector<8x8x8xbf16>
    "tpu.trace_start"() <{level = 10 : i32, message = "bqk,bkd->bqd"}> : () -> ()
    %cst_11 = arith.constant dense<0.000000e+00> : vector<8x8x8xf32>
    %41 = tpu.matmul %40, %28, %cst_11 {dimension_numbers = #tpu.dot_dimension_numbers<[2], [1], [1], [2], [0, 0, 0, 1, 1, 2], [0], [0]>} : vector<8x8x8xbf16>, vector<8x8x8xbf16>, vector<8x8x8xf32> -> vector<8x8x8xf32>
    "tpu.trace_stop"() : () -> ()
    %42 = vector.extract_strided_slice %41 {offsets = [0, 0, 0], sizes = [2, 8, 8], strides = [1, 1, 1]} : vector<8x8x8xf32> to vector<2x8x8xf32>
    %43 = vector.extract_strided_slice %41 {offsets = [2, 0, 0], sizes = [2, 8, 8], strides = [1, 1, 1]} : vector<8x8x8xf32> to vector<2x8x8xf32>
    %44 = vector.extract_strided_slice %41 {offsets = [4, 0, 0], sizes = [2, 8, 8], strides = [1, 1, 1]} : vector<8x8x8xf32> to vector<2x8x8xf32>
    %45 = vector.extract_strided_slice %41 {offsets = [6, 0, 0], sizes = [2, 8, 8], strides = [1, 1, 1]} : vector<8x8x8xf32> to vector<2x8x8xf32>
    %46 = tpu.concatenate %42, %43, %44, %45 in 2 : vector<2x8x8xf32>, vector<2x8x8xf32>, vector<2x8x8xf32>, vector<2x8x8xf32> -> vector<2x8x32xf32>
    %47 = vector.shape_cast %46 : vector<2x8x32xf32> to vector<16x32xf32>
    %48 = arith.truncf %47 : vector<16x32xf32> to vector<16x32xbf16>
    %c0_12 = arith.constant 0 : index
    %c0_13 = arith.constant 0 : index
    %c0_14 = arith.constant 0 : index
    %49 = vector.load %arg6[%c0_12, %c0_13, %c0_14] : memref<1x32x32xbf16, #tpu.memory_space<vmem>>, vector<1x32x32xbf16>
    %50 = vector.shape_cast %49 : vector<1x32x32xbf16> to vector<32x32xbf16>
    %cst_15 = arith.constant dense<0.000000e+00> : vector<16x32xf32>
    %51 = tpu.matmul %48, %50, %cst_15 {dimension_numbers = #tpu.dot_dimension_numbers<[1], [0], [0], [1], [0, 0, 1, 1], [], []>} : vector<16x32xbf16>, vector<32x32xbf16>, vector<16x32xf32> -> vector<16x32xf32>
    %c0_16 = arith.constant 0 : index
    %c0_17 = arith.constant 0 : index
    %c0_18 = arith.constant 0 : index
    %52 = vector.load %arg7[%c0_16, %c0_17, %c0_18] : memref<1x1x32xf32, #tpu.memory_space<vmem>>, vector<1x1x32xf32>
    %53 = vector.shape_cast %52 : vector<1x1x32xf32> to vector<1x32xf32>
    %54 = vector.broadcast %53 : vector<1x32xf32> to vector<16x32xf32>
    %55 = arith.addf %51, %54 : vector<16x32xf32>
    %56 = arith.addf %3, %55 : vector<16x32xf32>
    %c0_19 = arith.constant 0 : index
    %c0_20 = arith.constant 0 : index
    %c0_21 = arith.constant 0 : index
    %57 = vector.load %arg8[%c0_19, %c0_20, %c0_21] : memref<1x1x32xf32, #tpu.memory_space<vmem>>, vector<1x1x32xf32>
    %58 = vector.shape_cast %57 : vector<1x1x32xf32> to vector<1x32xf32>
    %c0_22 = arith.constant 0 : index
    %c0_23 = arith.constant 0 : index
    %c0_24 = arith.constant 0 : index
    %59 = vector.load %arg9[%c0_22, %c0_23, %c0_24] : memref<1x1x32xf32, #tpu.memory_space<vmem>>, vector<1x1x32xf32>
    %60 = vector.shape_cast %59 : vector<1x1x32xf32> to vector<1x32xf32>
    %cst_25 = arith.constant dense<0.000000e+00> : vector<16xf32>
    %61 = vector.multi_reduction <add>, %56, %cst_25 [1] : vector<16x32xf32> to vector<16xf32>
    %62 = vector.shape_cast %61 : vector<16xf32> to vector<16x1xf32>
    %cst_26 = arith.constant 3.200000e+01 : f32
    %63 = vector.broadcast %cst_26 : f32 to vector<16x1xf32>
    %64 = arith.divf %62, %63 : vector<16x1xf32>
    %65 = vector.broadcast %64 : vector<16x1xf32> to vector<16x32xf32>
    %66 = arith.subf %56, %65 : vector<16x32xf32>
    %67 = arith.mulf %66, %66 : vector<16x32xf32>
    %cst_27 = arith.constant dense<0.000000e+00> : vector<16xf32>
    %68 = vector.multi_reduction <add>, %67, %cst_27 [1] : vector<16x32xf32> to vector<16xf32>
    %69 = vector.shape_cast %68 : vector<16xf32> to vector<16x1xf32>
    %cst_28 = arith.constant 3.200000e+01 : f32
    %70 = vector.broadcast %cst_28 : f32 to vector<16x1xf32>
    %71 = arith.divf %69, %70 : vector<16x1xf32>
    %cst_29 = arith.constant 9.99999996E-13 : f32
    %72 = vector.broadcast %cst_29 : f32 to vector<16x1xf32>
    %73 = arith.addf %71, %72 : vector<16x1xf32>
    %74 = math.rsqrt %73 : vector<16x1xf32>
    %75 = vector.broadcast %74 : vector<16x1xf32> to vector<16x32xf32>
    %76 = arith.mulf %66, %75 : vector<16x32xf32>
    %77 = vector.broadcast %58 : vector<1x32xf32> to vector<16x32xf32>
    %78 = arith.mulf %76, %77 : vector<16x32xf32>
    %79 = vector.broadcast %60 : vector<1x32xf32> to vector<16x32xf32>
    %80 = arith.addf %78, %79 : vector<16x32xf32>
    %81 = arith.truncf %80 : vector<16x32xf32> to vector<16x32xbf16>
    %c0_30 = arith.constant 0 : index
    %c0_31 = arith.constant 0 : index
    %c0_32 = arith.constant 0 : index
    %82 = vector.load %arg10[%c0_30, %c0_31, %c0_32] : memref<1x32x64xbf16, #tpu.memory_space<vmem>>, vector<1x32x64xbf16>
    %83 = vector.shape_cast %82 : vector<1x32x64xbf16> to vector<32x64xbf16>
    %cst_33 = arith.constant dense<0.000000e+00> : vector<16x64xf32>
    %84 = tpu.matmul %81, %83, %cst_33 {dimension_numbers = #tpu.dot_dimension_numbers<[1], [0], [0], [1], [0, 0, 1, 1], [], []>} : vector<16x32xbf16>, vector<32x64xbf16>, vector<16x64xf32> -> vector<16x64xf32>
    %c0_34 = arith.constant 0 : index
    %c0_35 = arith.constant 0 : index
    %c0_36 = arith.constant 0 : index
    %85 = vector.load %arg11[%c0_34, %c0_35, %c0_36] : memref<1x1x64xf32, #tpu.memory_space<vmem>>, vector<1x1x64xf32>
    %86 = vector.shape_cast %85 : vector<1x1x64xf32> to vector<1x64xf32>
    %87 = vector.broadcast %86 : vector<1x64xf32> to vector<16x64xf32>
    %88 = arith.addf %84, %87 : vector<16x64xf32>
    %cst_37 = arith.constant 5.000000e-01 : f32
    %89 = vector.broadcast %cst_37 : f32 to vector<16x64xf32>
    %90 = arith.mulf %89, %88 : vector<16x64xf32>
    %cst_38 = arith.constant 4.471500e-02 : f32
    %91 = vector.broadcast %cst_38 : f32 to vector<16x64xf32>
    %92 = arith.mulf %91, %88 : vector<16x64xf32>
    %93 = arith.mulf %92, %88 : vector<16x64xf32>
    %94 = arith.mulf %93, %88 : vector<16x64xf32>
    %95 = arith.addf %88, %94 : vector<16x64xf32>
    %cst_39 = arith.constant 0.797884583 : f32
    %96 = vector.broadcast %cst_39 : f32 to vector<16x64xf32>
    %97 = arith.mulf %96, %95 : vector<16x64xf32>
    %98 = math.tanh %97 : vector<16x64xf32>
    %cst_40 = arith.constant 1.000000e+00 : f32
    %99 = vector.broadcast %cst_40 : f32 to vector<16x64xf32>
    %100 = arith.addf %99, %98 : vector<16x64xf32>
    %101 = arith.mulf %90, %100 : vector<16x64xf32>
    %102 = arith.truncf %101 : vector<16x64xf32> to vector<16x64xbf16>
    %c0_41 = arith.constant 0 : index
    %c0_42 = arith.constant 0 : index
    %c0_43 = arith.constant 0 : index
    %103 = vector.load %arg12[%c0_41, %c0_42, %c0_43] : memref<1x64x32xbf16, #tpu.memory_space<vmem>>, vector<1x64x32xbf16>
    %104 = vector.shape_cast %103 : vector<1x64x32xbf16> to vector<64x32xbf16>
    %cst_44 = arith.constant dense<0.000000e+00> : vector<16x32xf32>
    %105 = tpu.matmul %102, %104, %cst_44 {dimension_numbers = #tpu.dot_dimension_numbers<[1], [0], [0], [1], [0, 0, 1, 1], [], []>} : vector<16x64xbf16>, vector<64x32xbf16>, vector<16x32xf32> -> vector<16x32xf32>
    %c0_45 = arith.constant 0 : index
    %c0_46 = arith.constant 0 : index
    %c0_47 = arith.constant 0 : index
    %106 = vector.load %arg13[%c0_45, %c0_46, %c0_47] : memref<1x1x32xf32, #tpu.memory_space<vmem>>, vector<1x1x32xf32>
    %107 = vector.shape_cast %106 : vector<1x1x32xf32> to vector<1x32xf32>
    %108 = vector.broadcast %107 : vector<1x32xf32> to vector<16x32xf32>
    %109 = arith.addf %105, %108 : vector<16x32xf32>
    %110 = arith.addf %80, %109 : vector<16x32xf32>
    %c0_48 = arith.constant 0 : index
    %c0_49 = arith.constant 0 : index
    %c0_50 = arith.constant 0 : index
    %111 = vector.load %arg14[%c0_48, %c0_49, %c0_50] : memref<1x1x32xf32, #tpu.memory_space<vmem>>, vector<1x1x32xf32>
    %112 = vector.shape_cast %111 : vector<1x1x32xf32> to vector<1x32xf32>
    %c0_51 = arith.constant 0 : index
    %c0_52 = arith.constant 0 : index
    %c0_53 = arith.constant 0 : index
    %113 = vector.load %arg15[%c0_51, %c0_52, %c0_53] : memref<1x1x32xf32, #tpu.memory_space<vmem>>, vector<1x1x32xf32>
    %114 = vector.shape_cast %113 : vector<1x1x32xf32> to vector<1x32xf32>
    %cst_54 = arith.constant dense<0.000000e+00> : vector<16xf32>
    %115 = vector.multi_reduction <add>, %110, %cst_54 [1] : vector<16x32xf32> to vector<16xf32>
    %116 = vector.shape_cast %115 : vector<16xf32> to vector<16x1xf32>
    %cst_55 = arith.constant 3.200000e+01 : f32
    %117 = vector.broadcast %cst_55 : f32 to vector<16x1xf32>
    %118 = arith.divf %116, %117 : vector<16x1xf32>
    %119 = vector.broadcast %118 : vector<16x1xf32> to vector<16x32xf32>
    %120 = arith.subf %110, %119 : vector<16x32xf32>
    %121 = arith.mulf %120, %120 : vector<16x32xf32>
    %cst_56 = arith.constant dense<0.000000e+00> : vector<16xf32>
    %122 = vector.multi_reduction <add>, %121, %cst_56 [1] : vector<16x32xf32> to vector<16xf32>
    %123 = vector.shape_cast %122 : vector<16xf32> to vector<16x1xf32>
    %cst_57 = arith.constant 3.200000e+01 : f32
    %124 = vector.broadcast %cst_57 : f32 to vector<16x1xf32>
    %125 = arith.divf %123, %124 : vector<16x1xf32>
    %cst_58 = arith.constant 9.99999996E-13 : f32
    %126 = vector.broadcast %cst_58 : f32 to vector<16x1xf32>
    %127 = arith.addf %125, %126 : vector<16x1xf32>
    %128 = math.rsqrt %127 : vector<16x1xf32>
    %129 = vector.broadcast %128 : vector<16x1xf32> to vector<16x32xf32>
    %130 = arith.mulf %120, %129 : vector<16x32xf32>
    %131 = vector.broadcast %112 : vector<1x32xf32> to vector<16x32xf32>
    %132 = arith.mulf %130, %131 : vector<16x32xf32>
    %133 = vector.broadcast %114 : vector<1x32xf32> to vector<16x32xf32>
    %134 = arith.addf %132, %133 : vector<16x32xf32>
    %c0_59 = arith.constant 0 : index
    %c0_60 = arith.constant 0 : index
    %135 = vector.load %arg19[%c0_59, %c0_60] : memref<16x32xf32, #tpu.memory_space<vmem>>, vector<16x32xf32>
    tpu.vector_store %arg19[%c0_59, %c0_60], %134 {strides = array<i32>} : memref<16x32xf32, #tpu.memory_space<vmem>>, vector<16x32xf32>,
    %c1_i32 = arith.constant 1 : i32
    %136 = arith.cmpi eq, %arg0, %c1_i32 : i32
    %137 = arith.extui %136 : i1 to i32
    %c0_i32_61 = arith.constant 0 : i32
    %138 = arith.cmpi ne, %137, %c0_i32_61 : i32
    scf.if %138 {
      %139 = vector.shape_cast %134 : vector<16x32xf32> to vector<2x8x32xf32>
      %140 = vector.extract_strided_slice %139 {offsets = [0, 0, 0], sizes = [2, 1, 32], strides = [1, 1, 1]} : vector<2x8x32xf32> to vector<2x1x32xf32>
      %141 = vector.shape_cast %140 : vector<2x1x32xf32> to vector<2x32xf32>
      %142 = arith.truncf %141 : vector<2x32xf32> to vector<2x32xbf16>
      %c0_62 = arith.constant 0 : index
      %c0_63 = arith.constant 0 : index
      %143 = vector.load %arg16[%c0_62, %c0_63] : memref<32x128xbf16, #tpu.memory_space<vmem>>, vector<32x128xbf16>
      %cst_64 = arith.constant dense<0.000000e+00> : vector<2x128xf32>
      %144 = tpu.matmul %142, %143, %cst_64 {dimension_numbers = #tpu.dot_dimension_numbers<[1], [0], [0], [1], [0, 0, 1, 1], [], []>} : vector<2x32xbf16>, vector<32x128xbf16>, vector<2x128xf32> -> vector<2x128xf32>
      %c0_65 = arith.constant 0 : index
      %c0_66 = arith.constant 0 : index
      %145 = vector.load %arg17[%c0_65, %c0_66] : memref<1x128xf32, #tpu.memory_space<vmem>>, vector<1x128xf32>
      %146 = vector.broadcast %145 : vector<1x128xf32> to vector<2x128xf32>
      %147 = arith.addf %144, %146 : vector<2x128xf32>
      %c0_67 = arith.constant 0 : index
      %c0_68 = arith.constant 0 : index
      %148 = vector.load %arg18[%c0_67, %c0_68] : memref<2x128xf32, #tpu.memory_space<vmem>>, vector<2x128xf32>
      tpu.vector_store %arg18[%c0_67, %c0_68], %147 {strides = array<i32>} : memref<2x128xf32, #tpu.memory_space<vmem>>, vector<2x128xf32>,
    } else {
    }
    return
  }
  func.func @transform_0(%arg0: i32) -> (i32, i32, i32) {
    %c0_i32 = arith.constant 0 : i32
    %c0_i32_0 = arith.constant 0 : i32
    %c0_i32_1 = arith.constant 0 : i32
    %c0_i32_2 = arith.constant 0 : i32
    return %c0_i32, %c0_i32_0, %c0_i32_1 : i32, i32, i32
  }
  func.func @transform_1(%arg0: i32) -> (i32, i32) {
    %c0_i32 = arith.constant 0 : i32
    %c0_i32_0 = arith.constant 0 : i32
    %c0_i32_1 = arith.constant 0 : i32
    return %c0_i32, %c0_i32_0 : i32, i32
  }
  func.func @transform_2(%arg0: i32) -> (i32, i32) {
    %c0_i32 = arith.constant 0 : i32
    %c0_i32_0 = arith.constant 0 : i32
    %c0_i32_1 = arith.constant 0 : i32
    return %c0_i32, %c0_i32_0 : i32, i32
  }
  func.func @transform_3(%arg0: i32) -> (i32, i32, i32) {
    %c0_i32 = arith.constant 0 : i32
    %c0_i32_0 = arith.constant 0 : i32
    %c0_i32_1 = arith.constant 0 : i32
    return %arg0, %c0_i32, %c0_i32_0 : i32, i32, i32
  }
  func.func @transform_4(%arg0: i32) -> (i32, i32, i32) {
    %c0_i32 = arith.constant 0 : i32
    %c0_i32_0 = arith.constant 0 : i32
    %c0_i32_1 = arith.constant 0 : i32
    return %arg0, %c0_i32, %c0_i32_0 : i32, i32, i32
  }
  func.func @transform_5(%arg0: i32) -> (i32, i32, i32) {
    %c0_i32 = arith.constant 0 : i32
    %c0_i32_0 = arith.constant 0 : i32
    %c0_i32_1 = arith.constant 0 : i32
    return %arg0, %c0_i32, %c0_i32_0 : i32, i32, i32
  }
  func.func @transform_6(%arg0: i32) -> (i32, i32, i32) {
    %c0_i32 = arith.constant 0 : i32
    %c0_i32_0 = arith.constant 0 : i32
    %c0_i32_1 = arith.constant 0 : i32
    return %arg0, %c0_i32, %c0_i32_0 : i32, i32, i32
  }
  func.func @transform_7(%arg0: i32) -> (i32, i32, i32) {
    %c0_i32 = arith.constant 0 : i32
    %c0_i32_0 = arith.constant 0 : i32
    %c0_i32_1 = arith.constant 0 : i32
    return %arg0, %c0_i32, %c0_i32_0 : i32, i32, i32
  }
  func.func @transform_8(%arg0: i32) -> (i32, i32, i32) {
    %c0_i32 = arith.constant 0 : i32
    %c0_i32_0 = arith.constant 0 : i32
    %c0_i32_1 = arith.constant 0 : i32
    return %arg0, %c0_i32, %c0_i32_0 : i32, i32, i32
  }
  func.func @transform_9(%arg0: i32) -> (i32, i32, i32) {
    %c0_i32 = arith.constant 0 : i32
    %c0_i32_0 = arith.constant 0 : i32
    %c0_i32_1 = arith.constant 0 : i32
    return %arg0, %c0_i32, %c0_i32_0 : i32, i32, i32
  }
  func.func @transform_10(%arg0: i32) -> (i32, i32, i32) {
    %c0_i32 = arith.constant 0 : i32
    %c0_i32_0 = arith.constant 0 : i32
    %c0_i32_1 = arith.constant 0 : i32
    return %arg0, %c0_i32, %c0_i32_0 : i32, i32, i32
  }
  func.func @transform_11(%arg0: i32) -> (i32, i32, i32) {
    %c0_i32 = arith.constant 0 : i32
    %c0_i32_0 = arith.constant 0 : i32
    %c0_i32_1 = arith.constant 0 : i32
    return %arg0, %c0_i32, %c0_i32_0 : i32, i32, i32
  }
  func.func @transform_12(%arg0: i32) -> (i32, i32, i32) {
    %c0_i32 = arith.constant 0 : i32
    %c0_i32_0 = arith.constant 0 : i32
    %c0_i32_1 = arith.constant 0 : i32
    return %arg0, %c0_i32, %c0_i32_0 : i32, i32, i32
  }
  func.func @transform_13(%arg0: i32) -> (i32, i32, i32) {
    %c0_i32 = arith.constant 0 : i32
    %c0_i32_0 = arith.constant 0 : i32
    %c0_i32_1 = arith.constant 0 : i32
    return %arg0, %c0_i32, %c0_i32_0 : i32, i32, i32
  }
  func.func @transform_14(%arg0: i32) -> (i32, i32, i32) {
    %c0_i32 = arith.constant 0 : i32
    %c0_i32_0 = arith.constant 0 : i32
    %c0_i32_1 = arith.constant 0 : i32
    return %arg0, %c0_i32, %c0_i32_0 : i32, i32, i32
  }
  func.func @transform_15(%arg0: i32) -> (i32, i32) {
    %c0_i32 = arith.constant 0 : i32
    %c0_i32_0 = arith.constant 0 : i32
    %c0_i32_1 = arith.constant 0 : i32
    return %c0_i32, %c0_i32_0 : i32, i32
  }
  func.func @transform_16(%arg0: i32) -> (i32, i32) {
    %c0_i32 = arith.constant 0 : i32
    %c0_i32_0 = arith.constant 0 : i32
    %c0_i32_1 = arith.constant 0 : i32
    return %c0_i32, %c0_i32_0 : i32, i32
  }
  func.func @transform_17(%arg0: i32) -> (i32, i32) {
    %c0_i32 = arith.constant 0 : i32
    %c0_i32_0 = arith.constant 0 : i32
    %c0_i32_1 = arith.constant 0 : i32
    return %c0_i32, %c0_i32_0 : i32, i32
  }
}

</mosaic_0001>

<bundles_post_ra>
// kernel: tpu_custom_call.1
= control target key start
LH: loop header
LB: loop body
LE: loop exit
PB: predicated region body
PF: predicated region fallthrough
CT: control target
= control target key end

     0   :  { %s3925_s0 = inlined_call_operand.hbm [shape: f32[2,8,32], index: 0, kind: input, shape index: {}]   ;;  %s3926_s1 = inlined_call_operand.hbm [shape: f32[1,32], index: 1, kind: input, shape index: {}]   ;;  %s3927_s2 = inlined_call_operand.hbm [shape: f32[1,32], index: 2, kind: input, shape index: {}]   ;;  %s3928_s3 = inlined_call_operand.vmem [shape: bf16[2,32,96], index: 3, kind: input, shape index: {}]   ;;  %s3929_s4 = inlined_call_operand.hbm [shape: f32[2,1,96], index: 4, kind: input, shape index: {}]   ;;  %s3930_s5 = inlined_call_operand.vmem [shape: bf16[2,32,32], index: 5, kind: input, shape index: {}]   ;;  %s3931_s6 = inlined_call_operand.hbm [shape: f32[2,1,32], index: 6, kind: input, shape index: {}]   ;;  %s3932_s7 = inlined_call_operand.hbm [shape: f32[2,1,32], index: 7, kind: input, shape index: {}]   ;;  %s3933_s8 = inlined_call_operand.hbm [shape: f32[2,1,32], index: 8, kind: input, shape index: {}]   ;;  %s3934_s9 = inlined_call_operand.vmem [shape: bf16[2,32,64], index: 9, kind: input, shape index: {}]   ;;  %s3935_s10 = inlined_call_operand.vmem [shape: f32[2,1,64], index: 10, kind: input, shape index: {}]   ;;  %s3936_s11 = inlined_call_operand.vmem [shape: bf16[2,64,32], index: 11, kind: input, shape index: {}]   ;;  %s3937_s12 = inlined_call_operand.vmem [shape: f32[2,1,32], index: 12, kind: input, shape index: {}]   ;;  %s3938_s13 = inlined_call_operand.vmem [shape: f32[2,1,32], index: 13, kind: input, shape index: {}]   ;;  %s3939_s14 = inlined_call_operand.vmem [shape: f32[2,1,32], index: 14, kind: input, shape index: {}]   ;;  %s3940_s15 = inlined_call_operand.vmem [shape: bf16[32,128], index: 15, kind: input, shape index: {}]   ;;  %s3941_s16 = inlined_call_operand.vmem [shape: f32[1,128], index: 16, kind: input, shape index: {}]   ;;  %s3942_s17 = inlined_call_operand.hbm [shape: f32[2,128], index: 17, kind: output, shape index: {}]  }
   0x1   :  { %3955 = sst [smem:[#allocation24_spill]] %s3925_s0 }
   0x2   :  { %3956 = sst [smem:[#allocation25_spill]] %s3926_s1 }
   0x3   :  { %3957 = sst [smem:[#allocation26_spill]] %s3927_s2 }
   0x4   :  { %3958 = sst [smem:[#allocation27_spill]] %s3928_s3 }
   0x5   :  { %3959 = sst [smem:[#allocation28_spill]] %s3929_s4 }
   0x6   :  { %3960 = sst [smem:[#allocation29_spill]] %s3930_s5 }
   0x7   :  { %3961 = sst [smem:[#allocation30_spill]] %s3934_s9 }
   0x8   :  { %3962 = sst [smem:[#allocation31_spill]] %s3936_s11 }
   0x9   :  { %3963 = sst [smem:[#allocation32_spill]] %s3937_s12 }
   0xa   :  { %3964 = sst [smem:[#allocation33_spill]] %s3938_s13 }
   0xb   :  { %3965 = sst [smem:[#allocation34_spill]] %s3939_s14 }
   0xc   :  { %3966 = sst [smem:[#allocation35_spill]] %s3940_s15 }
   0xd   :  { %3967 = sst [smem:[#allocation36_spill]] %s3941_s16 }
   0xe   :  { %3968 = sst [smem:[#allocation37_spill]] %s3942_s17 }
   0xf   :  { %22 = vsyncpa [#allocation4], 0 }
  0x10   :  { %23 = vsyncpa [#allocation7], 0 }
  0x11   :  { %24 = vsyncpa [#allocation10], 0 }
  0x12   :  { %26 = vsyncpa [#allocation10 + $0x1], 0 }
  0x13   :  { %27 = vsyncpa [#allocation13], 0 }
  0x14   :  { %29 = vsyncpa [#allocation13 + $0x1], 0 }
  0x15   :  { %30 = vsyncpa [#allocation5], 0  ;;  %s3347_s24 = smov 0   ;;  %s3349_s25 = smov 0  }
  0x16   :  { %s3351_s26 = smov 0   ;;  %s3353_s27 = smov 0  }
  0x17 LB: > { %3969 = sst [smem:[#allocation21_spill]] %s3229_s26  ;;  %s3366_s28 = sadd.s32 4294967295, %s3233_s27   ;;  %s3233_s27 = sphi %s3353_s27, %s4012_s27   ;;  %s3229_s26 = sphi %s3351_s26, %s4014_s26   ;;  %s3225_s25 = sphi %s3349_s25, %s4016_s25   ;;  %s3221_s24 = sphi %s3347_s24, %s4015_s24  }
  0x18   : > { %p145_p0 = scmp.ne.s32.totalorder %s3225_s25, %s3221_s24  ;;  %p3947_p1 = scmp.eq.s32.totalorder %s3366_s28, 0 }
  0x19   : > { %p2514_p2 = scmp.ge.s32.totalorder %s3233_s27, 1  ;;  %p479_p3 = scmp.lt.s32.totalorder %s3233_s27, 3 }
  0x1a   : > { %p3375_p5 = por %p3947_p1, %p145_p0  ;;  %s3235_s30 = smov [#allocation6]  }
  0x1b   : > { %p3379_p6 = pnand %p2514_p2, %p479_p3  ;;  %s505_s18 = sshll.u32 %s3235_s30, 4  ;;  %s506_s18 = int_to_ptr.vmem [resolvable:$true] %s505_s18 }
  0x1c   : > { %s3970_s29 = scalar_select %p3375_p5, 1, 0 }
  0x1d   : > { %s3971_s0 = scalar_select %p3379_p6, 1, 0 }
  0x1e   : > { %p2812_p7 = pneg %p3379_p6  ;;  %s3386_s19 = sadd.s32 1, %s3233_s27  }
  0x1f   : > { %3972 = sst [smem:[#allocation22_spill]] %s3386_s19  ;;  %s129_s20 = ssub.s32 %s3233_s27, %s3386_s19 }
  0x20   : > { %p3390_p8 = pnand %p2812_p7, %p3947_p1  ;;  %p3396_p9 = scmp.eq.s32.totalorder %s129_s20, 0 }
  0x21   : > { %s132_s22 = sadd.s32 1, %s3229_s26  ;;  %p139_p10 = scmp.ne.s32.totalorder %s3229_s26, %s3225_s25 }
  0x22   : > { %s3973_s1 = scalar_select %p3390_p8, 1, 0 }
  0x23   : > { %p3948_p11 = pneg %p3390_p8  ;;  %s2980_s23 = scalar_lea.vmem %s506_s18, 16 }
  0x24   : > { %p2981_p12 = scmp.ne.s32.totalorder %s506_s18, %s2980_s23  ;;  %s2987_s24 = scalar_lea.vmem %s506_s18, 32 }
  0x25   : > { %p2988_p2 = scmp.lt.s32.totalorder %s506_s18, %s506_s18  ;;  %p2989_p3 = scmp.lt.s32.totalorder %s2987_s24, %s2980_s23 }
  0x26   : > { %p2983_p13 = pnand %p2981_p12, %p3948_p11 }
  0x27   : > { %p2990_p7 = por %p2989_p3, %p2988_p2 }
  0x28   : > { %p2984_p0 = pneg %p2983_p13 }
  0x2a   : > { %p2991_p4 = pnand %p2990_p7, %p2984_p0 }
  0x2c   : > { %2994 = shalt.err (!%p2991_p4)
}
  0x2d   : > { %s3975_s19 = sld [smem:[#allocation25_spill]]  ;;  %p140_p4 = scmp.eq.s32.totalorder %s3233_s27, 0 }
  0x2e   : > { %s3416_s23 = scalar_select %p3396_p9, %s3229_s26, %s132_s22  }
  0x2f   : > { %p2838_p12 = scmp.lt.s32.totalorder %s3233_s27, 2  ;;  %s3422_s17 = sand.u32 1, %s3229_s26  }
  0x30   : > { %3976 = sst [smem:[#allocation23_spill]] %s3416_s23  ;;  %p141_p13 = por %p140_p4, %p139_p10 }
  0x31   : > { %s3428_s30 = sshll.u32 %s3233_s27, 4  ;;  %s3977_s4 = sld [smem:[#allocation28_spill]] }
  0x32   : > { %p3439_p9 = pnand %p2838_p12, %p141_p13  ;;  %s3447_s23 = scalar_lea.hbm %s3932_s7, %s3428_s30 }
  0x33   : > { %2818 = dma.hbm_to_vmem [thread:$0]  (!%p3390_p8), %s3975_s19, 16, %s506_s18, [#allocation7]  }
  0x34   : > { %s544_s18 = scalar_lea.vmem [#allocation9], %s3422_s17  ;;  %s3979_s16 = sand.u32 1, %s3233_s27  }
  0x35   : > { %s551_s19 = sshll.u32 %s544_s18, 4  ;;  %s3451_s20 = scalar_lea.sflag [#allocation10], %s3979_s16  ;;  %s3437_s19 = int_to_ptr.vmem [resolvable:$true] %s551_s19 }
  0x36   : > { %p3457_p0 = pneg %p3439_p9 }
  0x37   : > { %s3434_s15 = scalar_lea.hbm %s3977_s4, %s3428_s30  ;;  %s3000_s24 = scalar_lea.hbm %s3977_s4, 32 }
  0x38   : > { %s2995_s26 = scalar_lea.hbm %s3434_s15, 16  ;;  %p3001_p7 = scmp.lt.s32.totalorder %s3434_s15, %s3977_s4 }
  0x39   : > { %p2996_p10 = scmp.ne.s32.totalorder %s3434_s15, %s2995_s26  ;;  %p3002_p4 = scmp.lt.s32.totalorder %s3000_s24, %s2995_s26 }
  0x3a   : > { %s3980_s18 = scalar_select %p3457_p0, 1, 0 }
  0x3b   : > { %p2998_p2 = pnand %p3457_p0, %p2996_p10  ;;  %p3003_p12 = por %p3002_p4, %p3001_p7 }
  0x3d   : > { %p2999_p3 = pneg %p2998_p2 }
  0x3f   : > { %p3004_p13 = pnand %p3003_p12, %p2999_p3 }
  0x41   : > { %3007 = shalt.err (!%p3004_p13)
}
  0x42   : > { %s3008_s16 = scalar_lea.vmem %s3437_s19, 16  ;;  %s3236_s11 = smov [#allocation9]  }
  0x43   : > { %p3009_p1 = scmp.ne.s32.totalorder %s3437_s19, %s3008_s16  ;;  %s3013_s13 = sshll.u32 %s3236_s11, 4  ;;  %s3014_s13 = int_to_ptr.vmem [resolvable:$false] %s3013_s13 }
  0x44   : > { %s3015_s14 = scalar_lea.vmem %s3014_s13, 32  ;;  %p3016_p11 = scmp.lt.s32.totalorder %s3437_s19, %s3014_s13 }
  0x45   : > { %p3011_p10 = pnand %p3009_p1, %p3457_p0  ;;  %p3017_p5 = scmp.lt.s32.totalorder %s3015_s14, %s3008_s16 }
  0x47   : > { %p3012_p2 = pneg %p3011_p10  ;;  %p3018_p6 = por %p3017_p5, %p3016_p11 }
  0x49   : > { %p3019_p8 = pnand %p3018_p6, %p3012_p2 }
  0x4b   : > { %3022 = shalt.err (!%p3019_p8)
}
  0x4c   : > { %2825 = dma.hbm_to_vmem [thread:$0]  (!%p3439_p9), %s3434_s15, 16, %s3437_s19, %s3451_s20  }
  0x4d   : > { %s586_s11 = scalar_lea.vmem [#allocation12], %s3422_s17  ;;  %s3237_s26 = smov [#allocation3]  }
  0x4e   : > { %s593_s12 = sshll.u32 %s586_s11, 4  ;;  %s491_s24 = sshll.u32 %s3237_s26, 4  ;;  %s594_s12 = int_to_ptr.vmem [resolvable:$true] %s593_s12  ;;  %s492_s24 = int_to_ptr.vmem [resolvable:$true] %s491_s24 }
  0x4f   : > { %s3981_s22 = sand.u32 1, %s3233_s27   ;;  %s3023_s13 = scalar_lea.hbm %s3447_s23, 16 }
  0x50   : > { %s3483_s16 = scalar_lea.sflag [#allocation13], %s3981_s22  ;;  %p3024_p1 = scmp.ne.s32.totalorder %s3447_s23, %s3023_s13 }
  0x51   : > { %s3028_s9 = scalar_lea.hbm %s3932_s7, 32  ;;  %p3029_p8 = scmp.lt.s32.totalorder %s3447_s23, %s3932_s7 }
  0x52   : > { %p3026_p5 = pnand %p3024_p1, %p3457_p0  ;;  %p3030_p11 = scmp.lt.s32.totalorder %s3028_s9, %s3023_s13 }
  0x54   : > { %p3027_p6 = pneg %p3026_p5  ;;  %p3031_p3 = por %p3030_p11, %p3029_p8 }
  0x56   : > { %p3032_p7 = pnand %p3031_p3, %p3027_p6 }
  0x58   : > { %3035 = shalt.err (!%p3032_p7)
}
  0x59   : > { %s3036_s15 = scalar_lea.vmem %s594_s12, 16  ;;  %s3238_s27 = smov [#allocation12]  }
  0x5a   : > { %p3037_p4 = scmp.ne.s32.totalorder %s594_s12, %s3036_s15  ;;  %s3041_s19 = sshll.u32 %s3238_s27, 4  ;;  %s3042_s19 = int_to_ptr.vmem [resolvable:$false] %s3041_s19 }
  0x5b   : > { %s3043_s11 = scalar_lea.vmem %s3042_s19, 32  ;;  %p3044_p10 = scmp.lt.s32.totalorder %s594_s12, %s3042_s19 }
  0x5c   : > { %p3039_p12 = pnand %p3037_p4, %p3457_p0  ;;  %p3045_p2 = scmp.lt.s32.totalorder %s3043_s11, %s3036_s15 }
  0x5e   : > { %p3040_p13 = pneg %p3039_p12  ;;  %p3046_p1 = por %p3045_p2, %p3044_p10 }
  0x60   : > { %p3047_p5 = pnand %p3046_p1, %p3040_p13 }
  0x62   : > { %3050 = shalt.err (!%p3047_p5)
}
  0x63   : > { %2831 = dma.hbm_to_vmem [thread:$0]  (!%p3439_p9), %s3447_s23, 16, %s594_s12, %s3483_s16  }
  0x64   : > { %s3062_s3 = scalar_lea.vmem %s492_s24, 256  ;;  %p3982_p8 = scmp.ne.s32.totalorder %s3973_s1, 0 }
  0x65   : > { %p3063_p6 = scmp.ne.s32.totalorder %s492_s24, %s3062_s3  ;;  %p3070_p4 = scmp.lt.s32.totalorder %s492_s24, %s492_s24 }
  0x66   : > { %p3983_p11 = pneg %p3982_p8  ;;  %p3071_p12 = scmp.lt.s32.totalorder %s3062_s3, %s3062_s3 }
  0x68   : > { %p3065_p3 = pnand %p3063_p6, %p3983_p11  ;;  %p3072_p0 = por %p3071_p12, %p3070_p4 }
  0x6a   : > { %p3066_p7 = pneg %p3065_p3 }
  0x6c   : > { %p3073_p2 = pnand %p3072_p0, %p3066_p7 }
  0x6e   : > { %3076 = shalt.err (!%p3073_p2)
}
  0x6f   : > { %s3239_s4 = smov 128   ;;  %s3240_s5 = smov 8  }
  0x70   : > { %s3984_s12 = sld [smem:[#allocation24_spill]]  ;;  %s3241_s26 = smov [#allocation8]  }
  0x71   : > { %s516_s22 = sshll.u32 %s3241_s26, 4  ;;  %s3514_s15 = scalar_lea.hbm %s3931_s6, %s3428_s30  ;;  %s517_s22 = int_to_ptr.vmem [resolvable:$true] %s516_s22 }
  0x72   : > { %s3088_s27 = scalar_lea.vmem %s517_s22, 16  ;;  %p3985_p13 = pmov %p3983_p11 }
  0x73   : > { %p3089_p0 = scmp.ne.s32.totalorder %s517_s22, %s3088_s27  ;;  %s3095_s19 = scalar_lea.vmem %s517_s22, 32 }
  0x74   : > { %p3096_p5 = scmp.lt.s32.totalorder %s517_s22, %s517_s22  ;;  %p3097_p6 = scmp.lt.s32.totalorder %s3095_s19, %s3088_s27 }
  0x75   : > { %p3091_p10 = pnand %p3089_p0, %p3985_p13 }
  0x76   : > { %2815 = dma.hbm_to_vmem [thread:$0]  (!%p3982_p8), %s3984_s12, 256, %s492_s24, [#allocation4], %s3239_s4, %s3239_s4, %s3240_s5  }
  0x77   : > { %p3092_p1 = pneg %p3091_p10  ;;  %p3098_p11 = por %p3097_p6, %p3096_p5 }
  0x79   : > { %p3099_p3 = pnand %p3098_p11, %p3092_p1 }
  0x7b   : > { %3102 = shalt.err (!%p3099_p3)
}
  0x7c   : > { %s3986_s2 = sld [smem:[#allocation26_spill]]  ;;  %s569_s3 = scalar_lea.vmem [#allocation11], %s3422_s17 }
  0x7d   : > { %s576_s4 = sshll.u32 %s569_s3, 4  ;;  %s3529_s23 = scalar_lea.hbm %s3933_s8, %s3428_s30  ;;  %s577_s4 = int_to_ptr.vmem [resolvable:$true] %s576_s4 }
  0x7e   : > { %s3103_s12 = scalar_lea.hbm %s3514_s15, 16  ;;  %p3987_p4 = scmp.ne.s32.totalorder %s3980_s18, 0 }
  0x7f   : > { %p3104_p7 = scmp.ne.s32.totalorder %s3514_s15, %s3103_s12  ;;  %s3108_s13 = scalar_lea.hbm %s3931_s6, 32 }
  0x80   : > { %p3110_p0 = scmp.lt.s32.totalorder %s3108_s13, %s3103_s12 }
  0x81   : > { %p3106_p12 = pnand %p3104_p7, %p3987_p4 }
  0x82   : > { %2821 = dma.hbm_to_vmem [thread:$0]  (!%p3982_p8), %s3986_s2, 16, %s517_s22, [#allocation7]  }
  0x83   : > { %p3107_p2 = pneg %p3106_p12  ;;  %p3109_p8 = scmp.lt.s32.totalorder %s3514_s15, %s3931_s6 }
  0x85   : > { %p3111_p13 = por %p3110_p0, %p3109_p8 }
  0x87   : > { %p3112_p10 = pnand %p3111_p13, %p3107_p2 }
  0x89   : > { %3115 = shalt.err (!%p3112_p10)
}
  0x8a   : > { %s3116_s22 = scalar_lea.vmem %s577_s4, 16  ;;  %s3242_s30 = smov [#allocation11]  }
  0x8b   : > { %p3117_p1 = scmp.ne.s32.totalorder %s577_s4, %s3116_s22  ;;  %s3121_s19 = sshll.u32 %s3242_s30, 4  ;;  %s3122_s19 = int_to_ptr.vmem [resolvable:$false] %s3121_s19 }
  0x8c   : > { %s3123_s24 = scalar_lea.vmem %s3122_s19, 32  ;;  %p3124_p11 = scmp.lt.s32.totalorder %s577_s4, %s3122_s19 }
  0x8d   : > { %p3119_p5 = pnand %p3117_p1, %p3987_p4  ;;  %p3125_p3 = scmp.lt.s32.totalorder %s3123_s24, %s3116_s22 }
  0x8f   : > { %p3120_p6 = pneg %p3119_p5  ;;  %p3126_p7 = por %p3125_p3, %p3124_p11 }
  0x91   : > { %p3127_p12 = pnand %p3126_p7, %p3120_p6 }
  0x93   : > { %3130 = shalt.err (!%p3127_p12)
}
  0x94   : > { %2828 = dma.hbm_to_vmem [thread:$0]  (!%p3439_p9), %s3514_s15, 16, %s577_s4, %s3451_s20  }
  0x95   : > { %s603_s11 = scalar_lea.vmem [#allocation14], %s3422_s17  ;;  %s3131_s5 = scalar_lea.hbm %s3529_s23, 16 }
  0x96   : > { %s610_s3 = sshll.u32 %s603_s11, 4  ;;  %p3132_p2 = scmp.ne.s32.totalorder %s3529_s23, %s3131_s5  ;;  %s611_s3 = int_to_ptr.vmem [resolvable:$true] %s610_s3 }
  0x97   : > { %s3136_s1 = scalar_lea.hbm %s3933_s8, 32  ;;  %p3137_p13 = scmp.lt.s32.totalorder %s3529_s23, %s3933_s8 }
  0x98   : > { %p3134_p8 = pnand %p3132_p2, %p3987_p4  ;;  %p3138_p10 = scmp.lt.s32.totalorder %s3136_s1, %s3131_s5 }
  0x9a   : > { %p3135_p0 = pneg %p3134_p8  ;;  %p3139_p1 = por %p3138_p10, %p3137_p13 }
  0x9c   : > { %p3140_p5 = pnand %p3139_p1, %p3135_p0 }
  0x9e   : > { %3143 = shalt.err (!%p3140_p5)
}
  0x9f   : > { %s3144_s17 = scalar_lea.vmem %s611_s3, 16  ;;  %s3243_s20 = smov [#allocation14]  }
  0xa0   : > { %p3145_p6 = scmp.ne.s32.totalorder %s611_s3, %s3144_s17  ;;  %s3149_s15 = sshll.u32 %s3243_s20, 4  ;;  %s3150_s15 = int_to_ptr.vmem [resolvable:$false] %s3149_s15 }
  0xa1   : > { %s3151_s4 = scalar_lea.vmem %s3150_s15, 32  ;;  %p3152_p7 = scmp.lt.s32.totalorder %s611_s3, %s3150_s15 }
  0xa2   : > { %p3147_p11 = pnand %p3145_p6, %p3987_p4  ;;  %p3153_p12 = scmp.lt.s32.totalorder %s3151_s4, %s3144_s17 }
  0xa4   : > { %p3148_p3 = pneg %p3147_p11  ;;  %p3154_p2 = por %p3153_p12, %p3152_p7 }
  0xa6   : > { %p3155_p8 = pnand %p3154_p2, %p3148_p3 }
  0xa8   : > { %3158 = shalt.err (!%p3155_p8)
}
  0xa9   : > { %2834 = dma.hbm_to_vmem [thread:$0]  (!%p3439_p9), %s3529_s23, 16, %s611_s3, %s3483_s16  }
  0xaa   : > { %p3988_p0 = scmp.ne.s32.totalorder %s3971_s0, 0 }
  0xab   : > { %p3989_p4 = scmp.eq.s32.totalorder (!%p3988_p0), %s3366_s28, 0 }
  0xac   : > { %659 = sbr.rel (%p3988_p0) target bundleno = 3329 (0xd01), region = 88 }
  0xb1   : > { %3200 = dma.done.wait (%p3989_p4), [#allocation4], 256   ;;  %p3990_p13 = pmov %p3989_p4 }
  0xb2   : > { %p3991_p10 = pmov %p3989_p4 }
  0xb3   : > { %3202 = vsyncadd (%p3990_p13), [#allocation4], 4294967040 }
  0xb4   : > { %3204 = dma.done.wait (%p3991_p10), [#allocation7], 32   ;;  %p3992_p1 = pmov %p3989_p4 }
  0xb5   : > { %s673_s21 = sand.u32 1, %s3366_s28   ;;  %s3578_s18 = sand.u32 1, %s3225_s25  }
  0xb6   : > { %3206 = vsyncadd (%p3992_p1), [#allocation7], 4294967264  ;;  %s674_s0 = scalar_lea.sflag [#allocation10], %s673_s21  ;;  %p3993_p9 = scmp.ne.s32.totalorder %s3970_s29, 0 }
  0xb8   : > { %3208 = dma.done.wait (%p3993_p9), %s674_s0, 32  }
  0xb9   : > { %3210 = vsyncadd (%p3993_p9), %s674_s0, 4294967264  ;;  %s690_s14 = scalar_lea.sflag [#allocation13], %s673_s21 }
  0xba   : > { %3212 = dma.done.wait (%p3993_p9), %s690_s14, 32  }
  0xbb   : > { %3214 = vsyncadd (%p3993_p9), %s690_s14, 4294967264  ;;  %p789_p5 = scmp.lt.s32.totalorder %s3366_s28, 1  ;;  %s3994_s5 = sld [smem:[#allocation27_spill]] }
  0xbc   : > { %s3995_s26 = sld [smem:[#allocation29_spill]]  ;;  %p4001_p6 = scmp.ne.s32.totalorder %s3366_s28, 0 }
  0xbd   : > { %s3593_s22 = scalar_select %p789_p5, %s3366_s28, 1 }
  0xbe   : > { %s3996_s15 = sld [smem:[#allocation30_spill]] }
  0xbf   : > { %s2593_s30 = sshll.u32 %s3593_s22, 4  ;;  %s2596_s21 = sshll.u32 %s3593_s22, 5 }
  0xc0   : > { %s3997_s19 = sld [smem:[#allocation31_spill]] }
  0xc1   : > { %s3603_s9 = scalar_lea.vmem %s3994_s5, %s2593_s30  ;;  %s3998_s29 = sld [smem:[#allocation32_spill]] }
  0xc2   : > { %s3608_s13 = scalar_lea.vmem %s3995_s26, %s2593_s30  ;;  %s3999_s12 = sld [smem:[#allocation33_spill]] }
  0xc3   : > { %s4000_s2 = sld [smem:[#allocation34_spill]] }
  0xc4   : > { %s3613_s4 = scalar_lea.vmem %s3996_s15, %s2593_s30  ;;  %s700_s30 = scalar_lea.vmem [#allocation14], %s3578_s18 }
  0xc5   : > { %825 = sbr.rel (%p4001_p6) target bundleno = 516 (0x204), region = 120 }
  0xc6   : > { %s3619_s24 = scalar_lea.vmem %s3997_s19, %s2596_s21 }
  0xc7   : > { %s814_s5 = scalar_lea.vmem %s3998_s29, %s3593_s22 }
  0xc8   : > { %s817_s1 = scalar_lea.vmem %s3999_s12, %s3593_s22 }
  0xc9   : > { %s820_s17 = scalar_lea.vmem %s4000_s2, %s3593_s22 }
  0xca   : > { %v826_v0 = vld [vmem:[#allocation3] sm:$0xff]  ;;  %vm830_vm0 = vcmask 261120   ;;  %v827_v1 = vld [vmem:[#allocation3 + $0x8] sm:$0xff]  ;;  %v2536_v21 = vld [vmem:[#allocation6] ss:$0 sm:$0xff] }
  0xcb   : > { %v831_v2 = vsel %vm830_vm0, %v826_v0, 0.0  ;;  %v834_v3 = vsel %vm830_vm0, %v827_v1, 0.0  ;;  %v2537_v23 = vld [vmem:[#allocation8] ss:$0 sm:$0xff] }
  0xcc   : > { %832 = vadd.xlane.f32.xlu0 %v831_v2 }
  0xd0   : > { %835 = vadd.xlane.f32.xlu0 %v834_v3 }
 0x155   : > { %v833_v4 = vpop.xlane.xlu0 %832 }
 0x156   : > { %v838_v5 = vmul.f32 0.03125, %v833_v4 }
 0x158   : > { %v840_v6 = vsub.f32 %v826_v0, %v838_v5 }
 0x159   : > { %v836_v7 = vpop.xlane.xlu0 %835 }
 0x15a   : > { %v839_v8 = vmul.f32 0.03125, %v836_v7  ;;  %v842_v9 = vmul.f32 %v840_v6, %v840_v6 }
 0x15c   : > { %v841_v10 = vsub.f32 %v827_v1, %v839_v8  ;;  %v844_v11 = vsel %vm830_vm0, %v842_v9, 0.0 }
 0x15d   : > { %845 = vadd.xlane.f32.xlu1 %v844_v11 }
 0x15e   : > { %v843_v12 = vmul.f32 %v841_v10, %v841_v10 }
 0x160   : > { %v847_v13 = vsel %vm830_vm0, %v843_v12, 0.0 }
 0x161   : > { %848 = vadd.xlane.f32.xlu1 %v847_v13 }
 0x1e6   : > { %v846_v14 = vpop.xlane.xlu1 %845 }
 0x1e7   : > { %v850_v15 = vmul.f32 0.03125, %v846_v14 }
 0x1e9   : > { %v852_v16 = vadd.f32 1e-12, %v850_v15 }
 0x1ea   : > { %v849_v17 = vpop.xlane.xlu1 %848 }
 0x1eb   : > { %2894 = vrsqrt.f32 %v852_v16  ;;  %v851_v18 = vmul.f32 0.03125, %v849_v17 }
 0x1ed   : > { %v853_v19 = vadd.f32 1e-12, %v851_v18 }
 0x1ef   : > { %2896 = vrsqrt.f32 %v853_v19 }
 0x1f8   : > { %v2895_v20 = vpop.eup %2894 }
 0x1f9   : > { %v856_v22 = vmul.f32 %v2895_v20, %v840_v6 }
 0x1fb   : > { %v864_v24 = vmul.f32 %v2536_v21, %v856_v22 }
 0x1fc   : > { %v2897_v25 = vpop.eup %2896 }
 0x1fd   : > { %v872_v26 = vadd.f32 %v2537_v23, %v864_v24  ;;  %v857_v27 = vmul.f32 %v2897_v25, %v841_v10 }
 0x1ff   : > { %874 = vst.msk [vmem:[#allocation2] sm:$0xff] %vm830_vm0, %v872_v26  ;;  %v865_v28 = vmul.f32 %v2536_v21, %v857_v27 }
 0x201   : > { %v873_v29 = vadd.f32 %v2537_v23, %v865_v28 }
 0x203   : > { %875 = vst.msk [vmem:[#allocation2 + $0x8] sm:$0xff] %vm830_vm0, %v873_v29 }
 0x204 PF: > { %v2913_v30 = vld [vmem:[%s3603_s9 + $0x8] sm:$0xff]   ;;  %v3244_v31 = vmov 0.0   ;;  %v2914_v32 = vld [vmem:[%s3603_s9] sm:$0xff]   ;;  %vm3245_vm1 = vmmov 0   ;;  %vm902_vm2 = vcmask 261120   ;;  %s4002_s2 = scalar_lea.vmem [#allocation9], %s3578_s18  ;;  %s4005_s14 = scalar_lea.vmem %s3935_s10, %s3593_s22 }
 0x205   : > { %2648 = vmatprep.subr.bf16.mxu0 %v3244_v31  ;;  %2656 = vmatprep.subr.bf16.mxu1 %v3244_v31  ;;  %v2538_v36 = vld [vmem:[%s4002_s2] ss:$0 sm:$0xff]  ;;  %s3246_s16 = smov 112   ;;  %s3247_s23 = smov 120   ;;  %vm967_vm3 = vcmask 64512   ;;  %vm1463_vm4 = vcmask 1043456  }
 0x206   : > { %2649 = vmatpush3.bf16.msra.mxu0 %v2913_v30  ;;  %2652 = vmatprep.mubr.msk.bf16.mxu0 %vm3245_vm1, %v3244_v31  ;;  %v3648_v33 = vld [vmem:[#allocation2] sm:$0xff]  ;;  %s3248_s27 = smov 104   ;;  %s3249_s11 = smov 96   ;;  %vm1869_vm5 = vcmask 130048   ;;  %vm1872_vm6 = vcmask 195584   ;;  %vm2116_vm7 = vcmask 523264  }
 0x207   : > { %2650 = vmatprep.subr.bf16.mxu0 %v3244_v31  ;;  %2658 = vmatprep.mubr.msk.bf16.mxu1 %vm3245_vm1, %v3244_v31  ;;  %s3250_s9 = smov 64   ;;  %s3251_s20 = smov 8  }
 0x208   : > { %s3252_s15 = smov 16   ;;  %s3253_s21 = smov 24  }
 0x209   : > { %s4004_s0 = scalar_lea.vmem [#allocation12], %s3578_s18  ;;  %p2584_p11 = scmp.ne.s32.totalorder %s3366_s28, 1 }
 0x20a   : > { %v3650_v34 = vld [vmem:[#allocation2 + $0x8] sm:$0xff]  ;;  %2651 = vmatpush3.bf16.msra.mxu0 %v2914_v32 }
 0x20b   : > { %v878_v35 = vpack.c.bf16 %v3650_v34, %v3648_v33  ;;  %2662 = vmatprep.subr.bf16.mxu0 %v3244_v31 }
 0x20d   : > { %2653 = vmatmul.mubr.msk.bf16.vlgmr.msra.gmra.mxu0 %vm902_vm2, %v878_v35 }
 0x20e   : > { %2664 = vmatprep.mubr.msk.bf16.mxu0 %vm3245_vm1, %v3244_v31 }
 0x2cd   : > { %v940_v37 = vpop.f32.mrf.mxu0 }
 0x2ce   : > { %v941_v38 = vadd.f32 %v2538_v36, %v940_v37 }
 0x2cf   : > { %v2654_v39 = vpop.f32.mrf.mxu0 }
 0x2d0   : > { %v2597_v40 = vpack.c.bf16 %v941_v38, %v941_v38 }
 0x2d1   : > { %v943_v41 = vpop.f32.mrf.mxu0 }
 0x2d2   : > { %v944_v42 = vadd.f32 %v2538_v36, %v943_v41  ;;  %957 = vrot.lane.b32.xlu1 %v2597_v40, %s3246_s16  ;;  %953 = vrot.lane.b32.xlu0 %v2597_v40, %s3247_s23 }
 0x2d3   : > { %v2655_v43 = vpop.f32.mrf.mxu0 }
 0x2d4   : > { %v3663_v44 = vpack.c.bf16 %v944_v42, %v944_v42 }
 0x2d6   : > { %959 = vrot.lane.b32.xlu1 %v3663_v44, %s3246_s16  ;;  %955 = vrot.lane.b32.xlu0 %v3663_v44, %s3247_s23  ;;  %s4009_s23 = sld [smem:[#allocation35_spill]] (!%p2584_p11) }
 0x2da   : > { %963 = vrot.lane.b32.xlu1 %v3663_v44, %s3248_s27  ;;  %961 = vrot.lane.b32.xlu0 %v2597_v40, %s3248_s27 }
 0x2de   : > { %1014 = vrot.lane.b32.xlu1 %v3663_v44, %s3249_s11  ;;  %965 = vrot.lane.b32.xlu0 %v2597_v40, %s3249_s11 }
 0x344   : > { %v958_v45 = vpop.permute.xlu1 %957  ;;  %v954_v46 = vpop.permute.xlu0 %953 }
 0x345   : > { %v3669_v47 = vcombine.low %v954_v46, %v954_v46  ;;  %v3672_v50 = vcombine.low %v958_v45, %v958_v45 }
 0x347   : > { %1064 = vrot.lane.b32.xlu0 %v3669_v47, %s3249_s11 }
 0x348   : > { %v960_v48 = vpop.permute.xlu1 %959  ;;  %v956_v49 = vpop.permute.xlu0 %955 }
 0x349   : > { %v3674_v51 = vcombine.low %v956_v49, %v956_v49  ;;  %v3678_v54 = vcombine.low %v960_v48, %v960_v48 }
 0x34b   : > { %1164 = vrot.lane.b32.xlu0 %v3672_v50, %s3249_s11  ;;  %1114 = vrot.lane.b32.xlu1 %v3674_v51, %s3249_s11 }
 0x34c   : > { %v964_v52 = vpop.permute.xlu1 %963  ;;  %v962_v53 = vpop.permute.xlu0 %961 }
 0x34d   : > { %v3680_v55 = vcombine.low %v962_v53, %v962_v53  ;;  %v3684_v58 = vcombine.low %v964_v52, %v964_v52 }
 0x34f   : > { %1214 = vrot.lane.b32.xlu1 %v3678_v54, %s3249_s11  ;;  %1264 = vrot.lane.b32.xlu0 %v3680_v55, %s3249_s11 }
 0x350   : > { %v1015_v56 = vpop.permute.xlu1 %1014  ;;  %v966_v57 = vpop.permute.xlu0 %965 }
 0x351   : > { %v1020_v59 = vsel %vm967_vm3, %v1015_v56, 0  ;;  %v972_v60 = vsel %vm967_vm3, %v966_v57, 0 }
 0x352   : > { %2657 = vmatpush3.bf16.xpose.msra.mxu1 %v972_v60  ;;  %2663 = vmatpush3.bf16.xpose.msra.mxu0 %v1020_v59 }
 0x353   : > { %1314 = vrot.lane.b32.xlu1 %v3684_v58, %s3249_s11  ;;  %2668 = vmatprep.subr.bf16.mxu1 %v3244_v31 }
 0x354   : > { %2674 = vmatprep.subr.bf16.mxu0 %v3244_v31 }
 0x357   : > { %1458 = vrot.lane.b32.xlu1 %v2597_v40, %s3250_s9 }
 0x359   : > { %2659 = vmatmul.mubr.msk.bf16.vlgmr.msra.gmra.mxu1 %vm967_vm3, %v2597_v40  ;;  %2665 = vmatmul.mubr.msk.bf16.vlgmr.msra.gmra.mxu0 %vm967_vm3, %v3663_v44 }
 0x35a   : > { %2670 = vmatprep.mubr.msk.bf16.mxu1 %vm3245_vm1, %v3244_v31  ;;  %2676 = vmatprep.mubr.msk.bf16.mxu0 %vm3245_vm1, %v3244_v31 }
 0x3b9   : > { %v1065_v61 = vpop.permute.xlu0 %1064 }
 0x3ba   : > { %v1070_v62 = vsel %vm967_vm3, %v1065_v61, 0 }
 0x3bb   : > { %2669 = vmatpush3.bf16.xpose.msra.mxu1 %v1070_v62 }
 0x3bc   : > { %2680 = vmatprep.subr.bf16.mxu1 %v3244_v31 }
 0x3bd   : > { %v1115_v63 = vpop.permute.xlu1 %1114  ;;  %v1165_v1 = vpop.permute.xlu0 %1164 }
 0x3be   : > { %v1120_v0 = vsel %vm967_vm3, %v1115_v63, 0  ;;  %v1170_v2 = vsel %vm967_vm3, %v1165_v1, 0 }
 0x3bf   : > { %2675 = vmatpush3.bf16.xpose.msra.mxu0 %v1120_v0 }
 0x3c0   : > { %2686 = vmatprep.subr.bf16.mxu0 %v3244_v31 }
 0x3c1   : > { %v1215_v3 = vpop.permute.xlu1 %1214  ;;  %v1265_v5 = vpop.permute.xlu0 %1264 }
 0x3c2   : > { %2671 = vmatmul.mubr.msk.bf16.vlgmr.msra.gmra.mxu1 %vm967_vm3, %v954_v46  ;;  %v1220_v4 = vsel %vm967_vm3, %v1215_v3, 0  ;;  %v1270_v7 = vsel %vm967_vm3, %v1265_v5, 0 }
 0x3c3   : > { %2681 = vmatpush3.bf16.xpose.msra.mxu1 %v1170_v2  ;;  %2682 = vmatprep.mubr.msk.bf16.mxu1 %vm3245_vm1, %v3244_v31 }
 0x3c4   : > { %2692 = vmatprep.subr.bf16.mxu1 %v3244_v31 }
 0x3c5   : > { %v1315_v6 = vpop.permute.xlu1 %1314 }
 0x3c6   : > { %2677 = vmatmul.mubr.msk.bf16.vlgmr.msra.gmra.mxu0 %vm967_vm3, %v956_v49  ;;  %v1320_v8 = vsel %vm967_vm3, %v1315_v6, 0 }
 0x3c7   : > { %2687 = vmatpush3.bf16.xpose.msra.mxu0 %v1220_v4  ;;  %2688 = vmatprep.mubr.msk.bf16.mxu0 %vm3245_vm1, %v3244_v31 }
 0x3c8   : > { %2698 = vmatprep.subr.bf16.mxu0 %v3244_v31 }
 0x3c9   : > { %v1459_v9 = vpop.permute.xlu1 %1458 }
 0x3ca   : > { %2683 = vmatmul.mubr.msk.bf16.vlgmr.msra.gmra.mxu1 %vm967_vm3, %v958_v45  ;;  %v1465_v10 = vsel %vm1463_vm4, %v1459_v9, 0 }
 0x3cb   : > { %2693 = vmatpush3.bf16.xpose.msra.mxu1 %v1270_v7  ;;  %2694 = vmatprep.mubr.msk.bf16.mxu1 %vm3245_vm1, %v3244_v31 }
 0x3cc   : > { %2704 = vmatprep.subr.bf16.mxu1 %v3244_v31 }
 0x3ce   : > { %2689 = vmatmul.mubr.msk.bf16.vlgmr.msra.gmra.mxu0 %vm967_vm3, %v960_v48 }
 0x3cf   : > { %2699 = vmatpush3.bf16.xpose.msra.mxu0 %v1320_v8  ;;  %2700 = vmatprep.mubr.msk.bf16.mxu0 %vm3245_vm1, %v3244_v31 }
 0x3d0   : > { %2710 = vmatprep.subr.bf16.mxu0 %v3244_v31 }
 0x3d2   : > { %2695 = vmatmul.mubr.msk.bf16.vlgmr.msra.gmra.mxu1 %vm967_vm3, %v962_v53 }
 0x3d3   : > { %2705 = vmatpush3.bf16.msra.mxu1 %v1465_v10  ;;  %2706 = vmatprep.mubr.msk.bf16.mxu1 %vm3245_vm1, %v3244_v31 }
 0x3d4   : > { %2716 = vmatprep.subr.bf16.mxu1 %v3244_v31 }
 0x3d6   : > { %2701 = vmatmul.mubr.msk.bf16.vlgmr.msra.gmra.mxu0 %vm967_vm3, %v964_v52 }
 0x3d7   : > { %2712 = vmatprep.mubr.msk.bf16.mxu0 %vm3245_vm1, %v3244_v31 }
 0x419   : > { %v1008_v11 = vpop.f32.mrf.mxu1  ;;  %v1056_v12 = vpop.f32.mrf.mxu0 }
 0x41a   : > { %v1362_v13 = vsel %vm967_vm3, %v1008_v11, -inf  ;;  %v1365_v14 = vsel %vm967_vm3, %v1056_v12, -inf }
 0x41b   : > { %1363 = vmax.xlane.f32.xlu0 %v1362_v13  ;;  %v2660_v15 = vpop.f32.mrf.mxu1  ;;  %1366 = vmax.xlane.f32.xlu1 %v1365_v14  ;;  %v2666_v16 = vpop.f32.mrf.mxu0 }
 0x41d   : > { %v1011_v17 = vpop.f32.mrf.mxu1  ;;  %v1059_v18 = vpop.f32.mrf.mxu0 }
 0x41f   : > { %v2661_v19 = vpop.f32.mrf.mxu1  ;;  %v2667_v20 = vpop.f32.mrf.mxu0 }
 0x482   : > { %v1106_v21 = vpop.f32.mrf.mxu1 }
 0x483   : > { %v1368_v22 = vsel %vm967_vm3, %v1106_v21, -inf }
 0x484   : > { %1369 = vmax.xlane.f32.xlu0 %v1368_v22  ;;  %v2672_v23 = vpop.f32.mrf.mxu1 }
 0x486   : > { %v1109_v24 = vpop.f32.mrf.mxu1  ;;  %v1156_v25 = vpop.f32.mrf.mxu0 }
 0x487   : > { %v1371_v26 = vsel %vm967_vm3, %v1156_v25, -inf }
 0x488   : > { %v2673_v27 = vpop.f32.mrf.mxu1  ;;  %1372 = vmax.xlane.f32.xlu0 %v1371_v26  ;;  %v2678_v28 = vpop.f32.mrf.mxu0 }
 0x48a   : > { %v1159_v29 = vpop.f32.mrf.mxu0  ;;  %v3735_v30 = vpop.f32.mrf.mxu1 }
 0x48b   : > { %v1374_v32 = vsel %vm967_vm3, %v3735_v30, -inf }
 0x48c   : > { %v2684_v35 = vpop.f32.mrf.mxu1  ;;  %1375 = vmax.xlane.f32.xlu1 %v1374_v32  ;;  %v2679_v36 = vpop.f32.mrf.mxu0 }
 0x48e   : > { %v1209_v37 = vpop.f32.mrf.mxu1  ;;  %v3739_v38 = vpop.f32.mrf.mxu0 }
 0x48f   : > { %v1377_v39 = vsel %vm967_vm3, %v3739_v38, -inf }
 0x490   : > { %v2685_v40 = vpop.f32.mrf.mxu1  ;;  %1378 = vmax.xlane.f32.xlu0 %v1377_v39  ;;  %v2690_v41 = vpop.f32.mrf.mxu0 }
 0x492   : > { %v1259_v42 = vpop.f32.mrf.mxu0  ;;  %v1306_v43 = vpop.f32.mrf.mxu1 }
 0x493   : > { %v1380_v45 = vsel %vm967_vm3, %v1306_v43, -inf }
 0x494   : > { %v2696_v46 = vpop.f32.mrf.mxu1  ;;  %1381 = vmax.xlane.f32.xlu1 %v1380_v45  ;;  %v2691_v48 = vpop.f32.mrf.mxu0 }
 0x496   : > { %v1309_v49 = vpop.f32.mrf.mxu1  ;;  %v1356_v52 = vpop.f32.mrf.mxu0 }
 0x497   : > { %v1383_v53 = vsel %vm967_vm3, %v1356_v52, -inf }
 0x498   : > { %v2697_v56 = vpop.f32.mrf.mxu1  ;;  %1384 = vmax.xlane.f32.xlu0 %v1383_v53  ;;  %v2702_v57 = vpop.f32.mrf.mxu0 }
 0x49a   : > { %v1359_v59 = vpop.f32.mrf.mxu0 }
 0x49c   : > { %v2703_v60 = vpop.f32.mrf.mxu0 }
 0x4a4   : > { %v1364_v61 = vpop.xlane.xlu0 %1363  ;;  %v1367_v62 = vpop.xlane.xlu1 %1366 }
 0x4a5   : > { %1555 = vrot.lane.b32.xlu1 %v3669_v47, %s3250_s9  ;;  %v1386_v63 = vsub.f32 %v1008_v11, %v1364_v61  ;;  %v1387_v0 = vsub.f32 %v1056_v12, %v1367_v62 }
 0x4a7   : > { %v1394_v1 = vmul.f32 1.442695, %v1386_v63  ;;  %v1396_v2 = vmul.f32 1.442695, %v1387_v0 }
 0x4a9   : > { %1603 = vrot.lane.b32.xlu1 %v3674_v51, %s3250_s9  ;;  %2923 = vpow2.f32 %v1394_v1 }
 0x4aa   : > { %2925 = vpow2.f32 %v1396_v2 }
 0x4ae   : > { %1507 = vrot.lane.b32.xlu0 %v3663_v44, %s3250_s9 }
 0x4b6   : > { %v2924_v3 = vpop.eup %2923 }
 0x4b7   : > { %v2926_v4 = vpop.eup %2925  ;;  %v1410_v5 = vsel %vm967_vm3, %v2924_v3, 0.0 }
 0x4b8   : > { %v1413_v47 = vsel %vm967_vm3, %v2926_v4, 0.0 }
 0x4cd   : > { %1411 = vadd.xlane.f32.xlu1 %v1410_v5  ;;  %1414 = vadd.xlane.f32.xlu0 %v1413_v47 }
 0x50d   : > { %v1370_v51 = vpop.xlane.xlu0 %1369 }
 0x50e   : > { %v1388_v6 = vsub.f32 %v1106_v21, %v1370_v51 }
 0x510   : > { %v1398_v7 = vmul.f32 1.442695, %v1388_v6 }
 0x511   : > { %v1373_v44 = vpop.xlane.xlu0 %1372 }
 0x512   : > { %2927 = vpow2.f32 %v1398_v7  ;;  %v1389_v8 = vsub.f32 %v1156_v25, %v1373_v44 }
 0x514   : > { %v1400_v9 = vmul.f32 1.442695, %v1389_v8 }
 0x515   : > { %v1376_v18 = vpop.xlane.xlu1 %1375 }
 0x516   : > { %2929 = vpow2.f32 %v1400_v9  ;;  %v1390_v19 = vsub.f32 %v3735_v30, %v1376_v18 }
 0x518   : > { %v1402_v22 = vmul.f32 1.442695, %v1390_v19 }
 0x519   : > { %v1379_v10 = vpop.xlane.xlu0 %1378 }
 0x51a   : > { %v1391_v21 = vsub.f32 %v3739_v38, %v1379_v10  ;;  %2931 = vpow2.f32 %v1402_v22 }
 0x51c   : > { %v1404_v24 = vmul.f32 1.442695, %v1391_v21 }
 0x51d   : > { %v1382_v20 = vpop.xlane.xlu1 %1381 }
 0x51e   : > { %v1392_v23 = vsub.f32 %v1306_v43, %v1382_v20  ;;  %2933 = vpow2.f32 %v1404_v24 }
 0x51f   : > { %v3753_v11 = vpop.eup %2927 }
 0x520   : > { %v1416_v12 = vsel %vm967_vm3, %v3753_v11, 0.0  ;;  %v1406_v25 = vmul.f32 1.442695, %v1392_v23 }
 0x521   : > { %1417 = vadd.xlane.f32.xlu1 %v1416_v12  ;;  %v1385_v13 = vpop.xlane.xlu0 %1384  ;;  %v1556_v28 = vpop.permute.xlu1 %1555 }
 0x522   : > { %v1393_v26 = vsub.f32 %v1356_v52, %v1385_v13  ;;  %2935 = vpow2.f32 %v1406_v25  ;;  %v1561_v49 = vsel %vm1463_vm4, %v1556_v28, 0 }
 0x523   : > { %v3757_v14 = vpop.eup %2929 }
 0x524   : > { %v1419_v15 = vsel %vm967_vm3, %v3757_v14, 0.0  ;;  %v1408_v27 = vmul.f32 1.442695, %v1393_v26 }
 0x525   : > { %1420 = vadd.xlane.f32.xlu0 %v1419_v15  ;;  %v1508_v16 = vpop.permute.xlu0 %1507  ;;  %v1604_v29 = vpop.permute.xlu1 %1603 }
 0x526   : > { %v1513_v17 = vsel %vm1463_vm4, %v1508_v16, 0  ;;  %2937 = vpow2.f32 %v1408_v27  ;;  %v1609_v52 = vsel %vm1463_vm4, %v1604_v29, 0 }
 0x527   : > { %2711 = vmatpush3.bf16.msra.mxu0 %v1513_v17 }
 0x528   : > { %2722 = vmatprep.subr.bf16.mxu0 %v3244_v31 }
 0x532   : > { %1699 = vrot.lane.b32.xlu1 %v3678_v54, %s3250_s9  ;;  %v3769_v54 = vpop.eup %2931 }
 0x533   : > { %v1422_v30 = vsel %vm967_vm3, %v3769_v54, 0.0 }
 0x53b   : > { %1651 = vrot.lane.b32.xlu0 %v3672_v50, %s3250_s9  ;;  %v3771_v50 = vpop.eup %2933 }
 0x53c   : > { %v3775_v32 = vpop.eup %2935  ;;  %v1425_v38 = vsel %vm967_vm3, %v3771_v50, 0.0 }
 0x53d   : > { %v1428_v37 = vsel %vm967_vm3, %v3775_v32, 0.0  ;;  %v3781_v39 = vpop.eup %2937 }
 0x53e   : > { %v1431_v40 = vsel %vm967_vm3, %v3781_v39, 0.0 }
 0x556   : > { %1423 = vadd.xlane.f32.xlu1 %v1422_v30  ;;  %v1412_v35 = vpop.xlane.xlu1 %1411  ;;  %v1415_v36 = vpop.xlane.xlu0 %1414 }
 0x557   : > { %2939 = vrcp.f32 %v1412_v35 }
 0x558   : > { %2941 = vrcp.f32 %v1415_v36 }
 0x55a   : > { %1429 = vadd.xlane.f32.xlu1 %v1428_v37  ;;  %1426 = vadd.xlane.f32.xlu0 %v1425_v38  ;;  %v2915_v37 = vld [vmem:[%s3608_s13 + $0x8] sm:$0xff]  }
 0x55e   : > { %1432 = vadd.xlane.f32.xlu0 %v1431_v40 }
 0x564   : > { %v2940_v41 = vpop.eup %2939 }
 0x565   : > { %v2942_v42 = vpop.eup %2941  ;;  %v1442_v43 = vmul.f32 %v2940_v41, %v2924_v3  ;;  %v2916_v41 = vld [vmem:[%s3608_s13] sm:$0xff]   ;;  %s4003_s13 = scalar_lea.vmem [#allocation11], %s3578_s18 }
 0x566   : > { %v1443_v45 = vmul.f32 %v2942_v42, %v2926_v4 }
 0x567   : > { %v1450_v46 = vpack.c.bf16 %v1442_v43, %v1442_v43 }
 0x568   : > { %v1451_v48 = vpack.c.bf16 %v1443_v45, %v1443_v45 }
 0x569   : > { %2707 = vmatmul.mubr.msk.bf16.vlgmr.msra.gmra.mxu1 %vm967_vm3, %v1450_v46 }
 0x56a   : > { %2713 = vmatmul.mubr.msk.bf16.vlgmr.msra.gmra.mxu0 %vm967_vm3, %v1451_v48  ;;  %2717 = vmatpush3.bf16.msra.mxu1 %v1561_v49 }
 0x56b   : > { %2723 = vmatpush3.bf16.msra.mxu0 %v1609_v52  ;;  %1795 = vrot.lane.b32.xlu1 %v3684_v58, %s3250_s9 }
 0x56c   : > { %2718 = vmatprep.mubr.msk.bf16.mxu1 %vm3245_vm1, %v3244_v31  ;;  %2728 = vmatprep.subr.bf16.mxu1 %v3244_v31 }
 0x56d   : > { %2724 = vmatprep.mubr.msk.bf16.mxu0 %vm3245_vm1, %v3244_v31  ;;  %2734 = vmatprep.subr.bf16.mxu0 %v3244_v31 }
 0x574   : > { %1747 = vrot.lane.b32.xlu0 %v3680_v55, %s3250_s9  ;;  %s4010_s9 = sld [smem:[#allocation36_spill]] (!%p2584_p11) }
 0x5aa   : > { %v1418_v53 = vpop.xlane.xlu1 %1417 }
 0x5ab   : > { %2943 = vrcp.f32 %v1418_v53 }
 0x5ae   : > { %v1421_v56 = vpop.xlane.xlu0 %1420  ;;  %v1700_v0 = vpop.permute.xlu1 %1699 }
 0x5af   : > { %2945 = vrcp.f32 %v1421_v56  ;;  %v1705_v1 = vsel %vm1463_vm4, %v1700_v0, 0 }
 0x5b2   : > { %v1652_v59 = vpop.permute.xlu0 %1651 }
 0x5b3   : > { %v1657_v62 = vsel %vm1463_vm4, %v1652_v59, 0 }
 0x5b8   : > { %v2944_v57 = vpop.eup %2943 }
 0x5b9   : > { %v1444_v58 = vmul.f32 %v2944_v57, %v3753_v11 }
 0x5bb   : > { %v1452_v60 = vpack.c.bf16 %v1444_v58, %v1444_v58 }
 0x5bc   : > { %v2946_v61 = vpop.eup %2945 }
 0x5bd   : > { %2719 = vmatmul.mubr.msk.bf16.vlgmr.msra.gmra.mxu1 %vm967_vm3, %v1452_v60  ;;  %v1445_v63 = vmul.f32 %v2946_v61, %v3757_v14 }
 0x5be   : > { %2729 = vmatpush3.bf16.msra.mxu1 %v1657_v62  ;;  %2730 = vmatprep.mubr.msk.bf16.mxu1 %vm3245_vm1, %v3244_v31 }
 0x5bf   : > { %v1453_v55 = vpack.c.bf16 %v1445_v63, %v1445_v63  ;;  %2740 = vmatprep.subr.bf16.mxu1 %v3244_v31 }
 0x5c1   : > { %2725 = vmatmul.mubr.msk.bf16.vlgmr.msra.gmra.mxu0 %vm967_vm3, %v1453_v55 }
 0x5c2   : > { %2735 = vmatpush3.bf16.msra.mxu0 %v1705_v1  ;;  %2736 = vmatprep.mubr.msk.bf16.mxu0 %vm3245_vm1, %v3244_v31 }
 0x5c3   : > { %2746 = vmatprep.subr.bf16.mxu0 %v3244_v31 }
 0x5df   : > { %v1424_v2 = vpop.xlane.xlu1 %1423 }
 0x5e0   : > { %2947 = vrcp.f32 %v1424_v2 }
 0x5e3   : > { %v1430_v3 = vpop.xlane.xlu1 %1429  ;;  %v1427_v4 = vpop.xlane.xlu0 %1426 }
 0x5e4   : > { %2949 = vrcp.f32 %v1430_v3 }
 0x5e5   : > { %2951 = vrcp.f32 %v1427_v4 }
 0x5e7   : > { %v1433_v5 = vpop.xlane.xlu0 %1432  ;;  %v1796_v11 = vpop.permute.xlu1 %1795 }
 0x5e8   : > { %2953 = vrcp.f32 %v1433_v5  ;;  %v1801_v15 = vsel %vm1463_vm4, %v1796_v11, 0  ;;  %v2566_v11 = vld [vmem:[%s4003_s13] ss:$0 sm:$0xff] }
 0x5eb   : > { %v1748_v6 = vpop.permute.xlu0 %1747 }
 0x5ec   : > { %v1753_v9 = vsel %vm1463_vm4, %v1748_v6, 0 }
 0x5ed   : > { %v2948_v47 = vpop.eup %2947 }
 0x5ee   : > { %v1446_v51 = vmul.f32 %v2948_v47, %v3769_v54 }
 0x5f0   : > { %v1454_v7 = vpack.c.bf16 %v1446_v51, %v1446_v51 }
 0x5f1   : > { %v2950_v44 = vpop.eup %2949 }
 0x5f2   : > { %v2952_v8 = vpop.eup %2951  ;;  %2731 = vmatmul.mubr.msk.bf16.vlgmr.msra.gmra.mxu1 %vm967_vm3, %v1454_v7  ;;  %v1448_v12 = vmul.f32 %v2950_v44, %v3775_v32 }
 0x5f3   : > { %2741 = vmatpush3.bf16.msra.mxu1 %v1753_v9  ;;  %v1447_v10 = vmul.f32 %v2952_v8, %v3771_v50  ;;  %2742 = vmatprep.mubr.msk.bf16.mxu1 %vm3245_vm1, %v3244_v31 }
 0x5f4   : > { %2752 = vmatprep.subr.bf16.mxu1 %v3244_v31  ;;  %v1456_v16 = vpack.c.bf16 %v1448_v12, %v1448_v12 }
 0x5f5   : > { %v1455_v13 = vpack.c.bf16 %v1447_v10, %v1447_v10  ;;  %v2954_v14 = vpop.eup %2953 }
 0x5f6   : > { %v1449_v17 = vmul.f32 %v2954_v14, %v3781_v39 }
 0x5f7   : > { %2737 = vmatmul.mubr.msk.bf16.vlgmr.msra.gmra.mxu0 %vm967_vm3, %v1455_v13 }
 0x5f8   : > { %2747 = vmatpush3.bf16.msra.mxu0 %v1801_v15  ;;  %2748 = vmatprep.mubr.msk.bf16.mxu0 %vm3245_vm1, %v3244_v31  ;;  %v1457_v18 = vpack.c.bf16 %v1449_v17, %v1449_v17 }
 0x5f9   : > { %2760 = vmatprep.subr.bf16.mxu0 %v3244_v31 }
 0x5fa   : > { %2743 = vmatmul.mubr.msk.bf16.vlgmr.msra.gmra.mxu1 %vm967_vm3, %v1456_v16 }
 0x5fb   : > { %2756 = vmatprep.mubr.msk.bf16.mxu1 %vm3245_vm1, %v3244_v31  ;;  %2753 = vmatpush3.bf16.msra.mxu1 %v2915_v37 }
 0x5fc   : > { %2754 = vmatprep.subr.bf16.mxu1 %v3244_v31 }
 0x5ff   : > { %2749 = vmatmul.mubr.msk.bf16.vlgmr.msra.gmra.mxu0 %vm967_vm3, %v1457_v18  ;;  %2755 = vmatpush3.bf16.msra.mxu1 %v2916_v41  ;;  %v2570_v41 = vld [vmem:[%s4004_s0] ss:$0 sm:$0xff] }
 0x600   : > { %2764 = vmatprep.mubr.msk.bf16.mxu0 %vm3245_vm1, %v3244_v31  ;;  %2768 = vmatprep.subr.bf16.mxu1 %v3244_v31 }
 0x629   : > { %v1501_v19 = vpop.f32.mrf.mxu1 }
 0x62a   : > { %v1549_v20 = vpop.f32.mrf.mxu0 }
 0x62b   : > { %v2708_v21 = vpop.f32.mrf.mxu1 }
 0x62c   : > { %v2714_v22 = vpop.f32.mrf.mxu0 }
 0x62d   : > { %v1504_v23 = vpop.f32.mrf.mxu1 }
 0x62e   : > { %v1552_v24 = vpop.f32.mrf.mxu0 }
 0x62f   : > { %v2709_v25 = vpop.f32.mrf.mxu1 }
 0x630   : > { %v2715_v26 = vpop.f32.mrf.mxu0 }
 0x67d   : > { %v1597_v27 = vpop.f32.mrf.mxu1 }
 0x67f   : > { %v2720_v28 = vpop.f32.mrf.mxu1 }
 0x681   : > { %v1600_v54 = vpop.f32.mrf.mxu1  ;;  %v1645_v29 = vpop.f32.mrf.mxu0 }
 0x682   : > { %v2898_v50 = vpack.i.bf16 %v1645_v29, %v1597_v27 }
 0x683   : > { %v2721_v30 = vpop.f32.mrf.mxu1  ;;  %v2726_v32 = vpop.f32.mrf.mxu0 }
 0x684   : > { %2899 = vrot.lane.b32.xlu0 %v2898_v50, %s3251_s20  ;;  %v2918_v50 = vld [vmem:[%s3613_s4] sm:$0xff]  }
 0x685   : > { %v1648_v35 = vpop.f32.mrf.mxu0 }
 0x687   : > { %v2727_v36 = vpop.f32.mrf.mxu0 }
 0x6b2   : > { %v1693_v38 = vpop.f32.mrf.mxu1 }
 0x6b4   : > { %v2732_v39 = vpop.f32.mrf.mxu1 }
 0x6b6   : > { %v1696_v40 = vpop.f32.mrf.mxu1 }
 0x6b7   : > { %v1741_v42 = vpop.f32.mrf.mxu0 }
 0x6b8   : > { %v2903_v43 = vpack.i.bf16 %v1741_v42, %v1693_v38  ;;  %v2733_v45 = vpop.f32.mrf.mxu1 }
 0x6b9   : > { %v2738_v46 = vpop.f32.mrf.mxu0 }
 0x6ba   : > { %2904 = vrot.lane.b32.xlu1 %v2903_v43, %s3252_s15  ;;  %v1789_v48 = vpop.f32.mrf.mxu1  ;;  %v2571_v46 = vld [vmem:[%s700_s30] ss:$0 sm:$0xff] }
 0x6bb   : > { %v1744_v49 = vpop.f32.mrf.mxu0 }
 0x6bc   : > { %v2744_v52 = vpop.f32.mrf.mxu1 }
 0x6bd   : > { %v2739_v53 = vpop.f32.mrf.mxu0 }
 0x6be   : > { %v1792_v56 = vpop.f32.mrf.mxu1 }
 0x6bf   : > { %v1837_v57 = vpop.f32.mrf.mxu0  ;;  %v2919_v56 = vld [vmem:[%s3619_s24 + $0x18] sm:$0xff]  }
 0x6c0   : > { %v2908_v58 = vpack.i.bf16 %v1837_v57, %v1789_v48  ;;  %v2745_v59 = vpop.f32.mrf.mxu1  ;;  %v2920_v57 = vld [vmem:[%s3619_s24 + $0x10] sm:$0xff]  }
 0x6c1   : > { %v2750_v60 = vpop.f32.mrf.mxu0  ;;  %v2922_v59 = vld [vmem:[%s3619_s24] sm:$0xff]  }
 0x6c2   : > { %2909 = vrot.lane.b32.xlu0 %v2908_v58, %s3253_s21  ;;  %v2921_v58 = vld [vmem:[%s3619_s24 + $0x8] sm:$0xff]   ;;  %v2572_v60 = vld [vmem:[%s4005_s14] ss:$0 sm:$0xff] }
 0x6c3   : > { %v1840_v61 = vpop.f32.mrf.mxu0 }
 0x6c5   : > { %v2751_v62 = vpop.f32.mrf.mxu0 }
 0x6f6   : > { %v2900_v63 = vpop.permute.xlu0 %2899 }
 0x6f7   : > { %v2902_v55 = vunpack.i.h.bf16 %v2900_v63  ;;  %v2901_v1 = vunpack.i.l.bf16 %v2900_v63 }
 0x6f9   : > { %v1868_v5 = vsel %vm967_vm3, %v1549_v20, %v2902_v55  ;;  %v1867_v47 = vsel %vm967_vm3, %v1501_v19, %v2901_v1 }
 0x72c   : > { %v2905_v0 = vpop.permute.xlu1 %2904 }
 0x72d   : > { %v2907_v2 = vunpack.i.h.bf16 %v2905_v0  ;;  %v2906_v3 = vunpack.i.l.bf16 %v2905_v0 }
 0x72f   : > { %v1871_v7 = vsel %vm1869_vm5, %v1868_v5, %v2907_v2  ;;  %v1870_v44 = vsel %vm1869_vm5, %v1867_v47, %v2906_v3 }
 0x734   : > { %v2910_v4 = vpop.permute.xlu0 %2909 }
 0x735   : > { %v2912_v51 = vunpack.i.h.bf16 %v2910_v4  ;;  %v2911_v6 = vunpack.i.l.bf16 %v2910_v4 }
 0x737   : > { %v1874_v8 = vsel %vm1872_vm6, %v1871_v7, %v2912_v51  ;;  %v1873_v9 = vsel %vm1872_vm6, %v1870_v44, %v2911_v6 }
 0x738   : > { %v1875_v10 = vpack.c.bf16 %v1874_v8, %v1873_v9 }
 0x73a   : > { %2757 = vmatmul.mubr.msk.bf16.vlgmr.msra.gmra.mxu1 %vm902_vm2, %v1875_v10 }
 0x73b   : > { %2776 = vmatprep.mubr.msk.bf16.mxu1 %vm3245_vm1, %v3244_v31  ;;  %2769 = vmatpush3.bf16.msra.mxu1 %v2919_v56 }
 0x73c   : > { %2770 = vmatprep.subr.bf16.mxu1 %v3244_v31 }
 0x73f   : > { %2771 = vmatpush3.bf16.msra.mxu1 %v2920_v57 }
 0x740   : > { %2772 = vmatprep.subr.bf16.mxu1 %v3244_v31 }
 0x743   : > { %2773 = vmatpush3.bf16.msra.mxu1 %v2921_v58 }
 0x744   : > { %2774 = vmatprep.subr.bf16.mxu1 %v3244_v31 }
 0x747   : > { %2775 = vmatpush3.bf16.msra.mxu1 %v2922_v59 }
 0x7fa   : > { %v1936_v12 = vpop.f32.mrf.mxu1 }
 0x7fb   : > { %v1937_v13 = vadd.f32 %v2566_v11, %v1936_v12 }
 0x7fc   : > { %v2758_v14 = vpop.f32.mrf.mxu1 }
 0x7fd   : > { %v1943_v15 = vadd.f32 %v1937_v13, %v3648_v33 }
 0x7fe   : > { %v1939_v16 = vpop.f32.mrf.mxu1 }
 0x7ff   : > { %v1940_v17 = vadd.f32 %v2566_v11, %v1939_v16  ;;  %v1947_v18 = vsel %vm902_vm2, %v1943_v15, 0.0 }
 0x800   : > { %1948 = vadd.xlane.f32.xlu1 %v1947_v18  ;;  %v2759_v19 = vpop.f32.mrf.mxu1 }
 0x801   : > { %v1944_v20 = vadd.f32 %v1940_v17, %v3650_v34  ;;  %v2917_v34 = vld [vmem:[%s3613_s4 + $0x8] sm:$0xff]   ;;  %v2576_v17 = vld [vmem:[%s814_s5] ss:$0 sm:$0xff] }
 0x802   : > { %2761 = vmatpush3.bf16.msra.mxu0 %v2917_v34 }
 0x803   : > { %v1950_v21 = vsel %vm902_vm2, %v1944_v20, 0.0  ;;  %2762 = vmatprep.subr.bf16.mxu0 %v3244_v31 }
 0x804   : > { %1951 = vadd.xlane.f32.xlu0 %v1950_v21 }
 0x806   : > { %2763 = vmatpush3.bf16.msra.mxu0 %v2918_v50 }
 0x889   : > { %v1949_v22 = vpop.xlane.xlu1 %1948 }
 0x88a   : > { %v1954_v23 = vmul.f32 0.03125, %v1949_v22 }
 0x88c   : > { %v1956_v24 = vsub.f32 %v1943_v15, %v1954_v23 }
 0x88d   : > { %v1952_v25 = vpop.xlane.xlu0 %1951 }
 0x88e   : > { %v1955_v26 = vmul.f32 0.03125, %v1952_v25  ;;  %v1958_v27 = vmul.f32 %v1956_v24, %v1956_v24 }
 0x890   : > { %v1957_v33 = vsub.f32 %v1944_v20, %v1955_v26  ;;  %v1960_v28 = vsel %vm902_vm2, %v1958_v27, 0.0 }
 0x891   : > { %1961 = vadd.xlane.f32.xlu0 %v1960_v28 }
 0x892   : > { %v1959_v54 = vmul.f32 %v1957_v33, %v1957_v33 }
 0x894   : > { %v1963_v29 = vsel %vm902_vm2, %v1959_v54, 0.0 }
 0x895   : > { %1964 = vadd.xlane.f32.xlu1 %v1963_v29 }
 0x91a   : > { %v1962_v30 = vpop.xlane.xlu0 %1961 }
 0x91b   : > { %v1966_v32 = vmul.f32 0.03125, %v1962_v30 }
 0x91d   : > { %v1968_v35 = vadd.f32 1e-12, %v1966_v32 }
 0x91e   : > { %v1965_v36 = vpop.xlane.xlu1 %1964 }
 0x91f   : > { %2955 = vrsqrt.f32 %v1968_v35  ;;  %v1967_v37 = vmul.f32 0.03125, %v1965_v36 }
 0x921   : > { %v1969_v38 = vadd.f32 1e-12, %v1967_v37 }
 0x923   : > { %2957 = vrsqrt.f32 %v1969_v38 }
 0x92c   : > { %v2956_v39 = vpop.eup %2955 }
 0x92d   : > { %v1972_v40 = vmul.f32 %v2956_v39, %v1956_v24 }
 0x92f   : > { %v1980_v45 = vmul.f32 %v2570_v41, %v1972_v40 }
 0x930   : > { %v2958_v42 = vpop.eup %2957 }
 0x931   : > { %v1973_v43 = vmul.f32 %v2958_v42, %v1957_v33  ;;  %v1988_v49 = vadd.f32 %v2571_v46, %v1980_v45  ;;  %v2582_v45 = vld [vmem:[%s817_s1] ss:$0 sm:$0xff] }
 0x933   : > { %v1981_v48 = vmul.f32 %v2570_v41, %v1973_v43 }
 0x935   : > { %v1989_v52 = vadd.f32 %v2571_v46, %v1981_v48  ;;  %v2583_v48 = vld [vmem:[%s820_s17] ss:$0 sm:$0xff] }
 0x937   : > { %v1990_v53 = vpack.c.bf16 %v1989_v52, %v1988_v49 }
 0x939   : > { %2765 = vmatmul.mubr.msk.bf16.vlgmr.msra.gmra.mxu0 %vm902_vm2, %v1990_v53 }
 0x9f9   : > { %v2051_v61 = vpop.f32.mrf.mxu0 }
 0x9fa   : > { %v2052_v62 = vadd.f32 %v2572_v60, %v2051_v61 }
 0x9fb   : > { %v2766_v63 = vpop.f32.mrf.mxu0 }
 0x9fc   : > { %v2060_v0 = vmul.f32 0.044715, %v2052_v62  ;;  %v2058_v11 = vmul.f32 0.5, %v2052_v62 }
 0x9fd   : > { %v2054_v55 = vpop.f32.mrf.mxu0 }
 0x9fe   : > { %v2062_v1 = vmul.f32 %v2060_v0, %v2052_v62  ;;  %v2055_v2 = vadd.f32 %v2572_v60, %v2054_v55 }
 0x9ff   : > { %v2767_v3 = vpop.f32.mrf.mxu0 }
 0xa00   : > { %v2064_v4 = vmul.f32 %v2062_v1, %v2052_v62  ;;  %v2061_v5 = vmul.f32 0.044715, %v2055_v2  ;;  %v2059_v12 = vmul.f32 0.5, %v2055_v2 }
 0xa02   : > { %v2066_v47 = vadd.f32 %v2064_v4, %v2052_v62  ;;  %v2063_v51 = vmul.f32 %v2061_v5, %v2055_v2 }
 0xa04   : > { %v2068_v6 = vmul.f32 0.7978846, %v2066_v47  ;;  %v2065_v31 = vmul.f32 %v2063_v51, %v2055_v2 }
 0xa06   : > { %2959 = vtanh.f32 %v2068_v6  ;;  %v2067_v7 = vadd.f32 %v2065_v31, %v2055_v2 }
 0xa08   : > { %v2069_v44 = vmul.f32 0.7978846, %v2067_v7 }
 0xa0a   : > { %2961 = vtanh.f32 %v2069_v44 }
 0xa13   : > { %v2960_v8 = vpop.eup %2959 }
 0xa14   : > { %v2072_v9 = vadd.f32 1.0, %v2960_v8 }
 0xa16   : > { %v2074_v14 = vmul.f32 %v2072_v9, %v2058_v11 }
 0xa17   : > { %v2962_v10 = vpop.eup %2961 }
 0xa18   : > { %v2073_v13 = vadd.f32 1.0, %v2962_v10 }
 0xa1a   : > { %v2075_v15 = vmul.f32 %v2073_v13, %v2059_v12 }
 0xa1c   : > { %v2076_v16 = vpack.c.bf16 %v2075_v15, %v2074_v14 }
 0xa1e   : > { %2777 = vmatmul.mubr.msk.bf16.vlgmr.msra.gmra.mxu1 %vm2116_vm7, %v2076_v16 }
 0xade   : > { %v2154_v18 = vpop.f32.mrf.mxu1 }
 0xadf   : > { %v2155_v19 = vadd.f32 %v2576_v17, %v2154_v18 }
 0xae0   : > { %v2778_v20 = vpop.f32.mrf.mxu1 }
 0xae1   : > { %v2161_v21 = vadd.f32 %v2155_v19, %v1988_v49 }
 0xae2   : > { %v2157_v22 = vpop.f32.mrf.mxu1 }
 0xae3   : > { %v2158_v23 = vadd.f32 %v2576_v17, %v2157_v22  ;;  %v2165_v24 = vsel %vm902_vm2, %v2161_v21, 0.0 }
 0xae4   : > { %2166 = vadd.xlane.f32.xlu0 %v2165_v24  ;;  %v2779_v25 = vpop.f32.mrf.mxu1 }
 0xae5   : > { %v2162_v26 = vadd.f32 %v2158_v23, %v1989_v52 }
 0xae7   : > { %v2168_v27 = vsel %vm902_vm2, %v2162_v26, 0.0 }
 0xae8   : > { %2169 = vadd.xlane.f32.xlu1 %v2168_v27 }
 0xb6d   : > { %v2167_v33 = vpop.xlane.xlu0 %2166 }
 0xb6e   : > { %v2171_v28 = vmul.f32 0.03125, %v2167_v33 }
 0xb70   : > { %v2173_v54 = vsub.f32 %v2161_v21, %v2171_v28 }
 0xb71   : > { %v2170_v29 = vpop.xlane.xlu1 %2169 }
 0xb72   : > { %v2172_v34 = vmul.f32 0.03125, %v2170_v29  ;;  %v2175_v50 = vmul.f32 %v2173_v54, %v2173_v54 }
 0xb74   : > { %v2174_v30 = vsub.f32 %v2162_v26, %v2172_v34  ;;  %v2177_v32 = vsel %vm902_vm2, %v2175_v50, 0.0 }
 0xb75   : > { %2178 = vadd.xlane.f32.xlu0 %v2177_v32 }
 0xb76   : > { %v2176_v35 = vmul.f32 %v2174_v30, %v2174_v30 }
 0xb78   : > { %v2180_v36 = vsel %vm902_vm2, %v2176_v35, 0.0 }
 0xb79   : > { %2181 = vadd.xlane.f32.xlu1 %v2180_v36 }
 0xbfe   : > { %v2179_v37 = vpop.xlane.xlu0 %2178 }
 0xbff   : > { %v2183_v38 = vmul.f32 0.03125, %v2179_v37 }
 0xc01   : > { %v2185_v39 = vadd.f32 1e-12, %v2183_v38 }
 0xc02   : > { %v2182_v40 = vpop.xlane.xlu1 %2181 }
 0xc03   : > { %2963 = vrsqrt.f32 %v2185_v39  ;;  %v2184_v41 = vmul.f32 0.03125, %v2182_v40 }
 0xc05   : > { %v2186_v42 = vadd.f32 1e-12, %v2184_v41 }
 0xc07   : > { %2965 = vrsqrt.f32 %v2186_v42 }
 0xc10   : > { %v2964_v43 = vpop.eup %2963 }
 0xc11   : > { %v2189_v46 = vmul.f32 %v2964_v43, %v2173_v54 }
 0xc13   : > { %v2197_v49 = vmul.f32 %v2582_v45, %v2189_v46 }
 0xc14   : > { %v2966_v52 = vpop.eup %2965 }
 0xc15   : > { %v2205_v53 = vadd.f32 %v2583_v48, %v2197_v49  ;;  %v2190_v56 = vmul.f32 %v2966_v52, %v2174_v30 }
 0xc17   : > { %2207 = vst.msk [vmem:[#allocation2] sm:$0xff] %vm902_vm2, %v2205_v53  ;;  %v2198_v57 = vmul.f32 %v2582_v45, %v2190_v56  ;;  %2212 = sbr.rel (%p2584_p11) target bundleno = 3308 (0xcec), region = 124 }
 0xc19   : > { %v2206_v58 = vadd.f32 %v2583_v48, %v2198_v57 }
 0xc1b   : > { %2208 = vst.msk [vmem:[#allocation2 + $0x8] sm:$0xff] %vm902_vm2, %v2206_v58 }
 0xc1c   : > { %v2967_v59 = vld [vmem:[%s4009_s23 + $0x8] sm:$0xff]   ;;  %v2213_v60 = vpack.c.bf16 %v2205_v53, %v2205_v53  ;;  %v2214_v61 = vpack.c.bf16 %v2206_v58, %v2206_v58  ;;  %v3254_v62 = vmov 0.0   ;;  %v2968_v63 = vld [vmem:[%s4009_s23] sm:$0xff]   ;;  %vm3255_vm8 = vmmov 0  }
 0xc1d   : > { %2780 = vmatprep.subr.bf16.mxu0 %v3254_v62  ;;  %2784 = vmatprep.mubr.msk.bf16.mxu0 %vm3255_vm8, %v3254_v62  ;;  %vm2231_vm9 = vcmask 1041409   ;;  %v2585_v4 = vld [vmem:[%s4010_s9] ss:$0 sm:$0xff] }
 0xc1e   : > { %2781 = vmatpush3.bf16.msra.mxu0 %v2967_v59  ;;  %v2228_v0 = vunpack.c.l.b16 %v2213_v60  ;;  %v2229_v55 = vunpack.c.l.b16 %v2214_v61 }
 0xc1f   : > { %2782 = vmatprep.subr.bf16.mxu0 %v3254_v62 }
 0xc20   : > { %v2230_v1 = vrot.slane %v2229_v55, 7 }
 0xc22   : > { %2783 = vmatpush3.bf16.msra.mxu0 %v2968_v63  ;;  %v2232_v2 = vsel %vm2231_vm9, %v2230_v1, %v2228_v0 }
 0xc23   : > { %v2233_v3 = vpack.c.b16 %v2232_v2, %v2232_v2 }
 0xc25   : > { %2785 = vmatmul.mubr.msk.bf16.vlgmr.msra.gmra.mxu0 %vm902_vm2, %v2233_v3 }
 0xce5   : > { %v2283_v5 = vpop.f32.mrf.mxu0 }
 0xce6   : > { %v2284_v47 = vadd.f32 %v2585_v4, %v2283_v5 }
 0xce7   : > { %v2786_v51 = vpop.f32.mrf.mxu0 }
 0xce8   : > { %2289 = vst [vmem:[#allocation15] sm:$0x3] %v2284_v47 }
 0xce9   : > { %v2286_v6 = vpop.f32.mrf.mxu0 }
 0xceb   : > { %v2787_v31 = vpop.f32.mrf.mxu0 }
 0xcec PF: > { %p2842_p3 = scmp.eq.s32.totalorder %s3366_s28, 1  ;;  %s3256_s20 = smov [#allocation15]  }
 0xced   : > { %s2297_s15 = sshll.u32 %s3256_s20, 4  ;;  %s2298_s15 = int_to_ptr.vmem [resolvable:$true] %s2297_s15 }
 0xcee   : > { %s3159_s21 = scalar_lea.vmem %s2298_s15, 32  ;;  %p3166_p8 = scmp.lt.s32.totalorder %s2298_s15, %s2298_s15 }
 0xcef   : > { %p3160_p7 = scmp.ne.s32.totalorder %s2298_s15, %s3159_s21  ;;  %p3167_p0 = scmp.lt.s32.totalorder %s3159_s21, %s3159_s21 }
 0xcf1   : > { %p3161_p12 = pnand %p3160_p7, %p2842_p3  ;;  %p3168_p4 = por %p3167_p0, %p3166_p8 }
 0xcf3   : > { %p3162_p2 = pneg %p3161_p12 }
 0xcf5   : > { %p3169_p13 = pnand %p3168_p4, %p3162_p2 }
 0xcf7   : > { %3172 = shalt.err (!%p3169_p13)
}
 0xcf8   : > { %s4011_s18 = sld [smem:[#allocation37_spill]] }
 0xcfe   : > { %2809 = dma.vmem_to_hbm [thread:$0]  (%p2842_p3), %s2298_s15, 32, %s4011_s18, [#allocation5]  }
 0xcff   : > { %3216 = dma.done.wait (%p2842_p3), [#allocation5], 32  }
 0xd00   : > { %3218 = vsyncadd (%p2842_p3), [#allocation5], 4294967264 }
 0xd01 PF: > { %s4012_s27 = sld [smem:[#allocation22_spill]]  ;;  %s4015_s24 = smov %s3225_s25 }
 0xd02   : > { %s4013_s4 = sld [smem:[#allocation21_spill]] }
 0xd03   : > { %s4014_s26 = sld [smem:[#allocation23_spill]] }
 0xd07   : > { %p33_p10 = scmp.ge.s32.totalorder %s4012_s27, 4  }
 0xd08   : > { %s4016_s25 = smov %s4013_s4 }
 0xd09   :  { %35 = sbr.rel (!%p33_p10) target bundleno = 23 (0x17), region = 205 }
 0xd0e   :  { %2310 = vsyncpa [#allocation4], 1 }
 0xd0f   :  { %2312 = vsyncpa [#allocation4 + $0x1], 1 }
 0xd10   :  { %2313 = vsyncpa [#allocation7], 1 }
 0xd11   :  { %2314 = vsyncpa [#allocation10], 1 }
 0xd12   :  { %2316 = vsyncpa [#allocation10 + $0x1], 1 }
 0xd13   :  { %2317 = vsyncpa [#allocation13], 1 }
 0xd14   :  { %2319 = vsyncpa [#allocation13 + $0x1], 1 }
 0xd15   :  { %2320 = vsyncpa [#allocation5], 1 }
 0xd16   :  { %2322 = vsyncpa [#allocation5 + $0x1], 1 }

</bundles_post_ra>
